<compile_context>
chip_gen: v7x
topology: tpu7x:2x2x1
jax: 0.10.0
libtpu: 0.0.40
codegen_flags: <defaults>
</compile_context>

<pallas_src>
import functools

import jax
import jax.numpy as jnp
from jax.experimental import pallas as pl
from jax.experimental.pallas import tpu as pltpu


# ----------------------------------------------------------------------------
# Fused kernel: one grid step == BLOCK_B images; all weights stay VMEM-resident.
#
# Activation layouts (rows x cols), B = BLOCK_B:
#   input   x  : (32, 32B)    col = j*B + b
#   conv1   o1 : (168, 28B)   row = i*6  + cout,  col = j*B + b
#   pool1   p1 : (96, 14B)    row = i*6  + cin (rows 84..95 zero pad)
#   conv2   o2 : (160, 10B)   row = cout*10 + i
#   pool2   p2 : (80, 5B)     row = cout*5  + i
#   fc*        : (K, B)       batch GEMMs
# ----------------------------------------------------------------------------
def _lenet_kernel(x_ref, k1_ref, k2_ref, pr1_ref, pc1_ref, pr2_ref, pc2_ref,
                  w3_ref, w4_ref, w5_ref, bias_ref, o_ref, *, block_b):
    B = block_b
    f32 = jnp.float32
    bf16 = jnp.bfloat16

    def mm(a, b):
        return jnp.dot(a, b, preferred_element_type=f32)   # bf16 MXU, f32 accumulate

    bias = bias_ref[...]                                    # (542, 1) f32
    b1, b2 = bias[0:168], bias[168:328]
    b3, b4, b5 = bias[328:448], bias[448:532], bias[532:542]

    # ---- conv1 (1->6, 5x5, input pre-padded to 32x32) + tanh ----------------
    x_bf = x_ref[...].astype(bf16)                           # (32, 32B)
    # 5 horizontal shifts stacked along K (chunks of 32 rows -> tile aligned)
    win1 = jnp.concatenate(
        [x_bf[:, dj * B:(dj + 28) * B] for dj in range(5)], axis=0)   # (160, 28B)
    o1 = jnp.tanh(mm(k1_ref[...], win1) + b1)                # (168, 28B)

    # ---- avgpool1 2x2 (constant 0.5 pooling matmuls) ------------------------
    p1 = mm(mm(pr1_ref[...], o1.astype(bf16)).astype(bf16), pc1_ref[...])   # (96, 14B)
    p1_bf = p1.astype(bf16)

    # ---- conv2 (6->16, 5x5 valid) + tanh ------------------------------------
    win2 = jnp.concatenate(
        [p1_bf[:, dj * B:(dj + 10) * B] for dj in range(5)], axis=0)  # (480, 10B)
    o2 = jnp.tanh(mm(k2_ref[...], win2) + b2)                # (160, 10B)

    # ---- avgpool2 2x2 --------------------------------------------------------
    p2 = mm(mm(pr2_ref[...], o2.astype(bf16)).astype(bf16), pc2_ref[...])   # (80, 5B)
    p2_bf = p2.astype(bf16)

    # ---- fc1/fc2/fc3 as batch GEMMs ------------------------------------------
    # NCHW flatten folded into w3's column order; chunks of 80 rows (aligned).
    z = jnp.concatenate([p2_bf[:, jo * B:(jo + 1) * B] for jo in range(5)],
                        axis=0)                              # (400, B)
    y3 = jnp.tanh(mm(w3_ref[...], z) + b3)                   # (120, B)
    y4 = jnp.tanh(mm(w4_ref[...], y3.astype(bf16)) + b4)     # (84, B)
    o_ref[...] = mm(w5_ref[...], y4.astype(bf16)) + b5       # (10, B)


# ----------------------------------------------------------------------------
# Host-side one-time weight repacking (banded conv slabs, pooling matrices,
# permuted fc1, merged biases).  All matmul operands cast to bf16.
# ----------------------------------------------------------------------------
def _half_pool(n_out):
    idx = jnp.arange(n_out)
    m = jnp.zeros((n_out, 2 * n_out), jnp.float32)
    return m.at[idx, 2 * idx].set(0.5).at[idx, 2 * idx + 1].set(0.5)


def _prepare_constants(p, B):
    f32, bf16 = jnp.float32, jnp.bfloat16
    w1 = p["w1"].astype(f32)                                 # (6, 1, 5, 5)  OIHW
    w2 = p["w2"].astype(f32)                                 # (16, 6, 5, 5) OIHW

    # conv1: banded slabs A_dj (168, 32) with A_dj[i*6+co, r] = w1[co,0,r-i,dj]
    k1 = jnp.concatenate([
        sum(jnp.kron(jnp.eye(28, 32, k=di, dtype=f32), w1[:, 0, di, dj].reshape(6, 1))
            for di in range(5))
        for dj in range(5)], axis=1)                         # (168, 160)
    # conv2: banded slabs A2_dj (160, 96) with A2_dj[co*10+i, r*6+ci] = w2[co,ci,r-i,dj]
    shift = [jnp.eye(10, 16, k=di, dtype=f32) for di in range(5)]
    k2 = jnp.concatenate([
        sum(jnp.einsum("ir,oc->oirc", shift[di], w2[:, :, di, dj]).reshape(160, 96)
            for di in range(5))
        for dj in range(5)], axis=1)                         # (160, 480)

    hp14 = _half_pool(14)                                    # (14, 28)
    hp5 = _half_pool(5)                                      # (5, 10)
    pr1 = jnp.concatenate([jnp.kron(hp14, jnp.eye(6, dtype=f32)),
                           jnp.zeros((12, 168), f32)], axis=0)        # (96, 168)
    pc1 = jnp.kron(hp14.T, jnp.eye(B, dtype=f32))                     # (28B, 14B)
    pr2 = jnp.kron(jnp.eye(16, dtype=f32), hp5)                       # (80, 160)
    pc2 = jnp.kron(hp5.T, jnp.eye(B, dtype=f32))                      # (10B, 5B)

    # fc1 columns reordered to (jo, co, io) to match the in-kernel stacking.
    w3c = jnp.transpose(p["w3"].astype(f32).reshape(16, 5, 5, 120),
                        (3, 2, 0, 1)).reshape(120, 400)               # (120, 400)
    w4t = p["w4"].astype(f32).T                                       # (84, 120)
    w5t = p["w5"].astype(f32).T                                       # (10, 84)

    biases = jnp.concatenate([
        jnp.tile(p["b1"].astype(f32), 28),        # 168: rows i*6+co
        jnp.repeat(p["b2"].astype(f32), 10),      # 160: rows co*10+i
        p["b3"].astype(f32),                      # 120
        p["b4"].astype(f32),                      # 84
        p["b5"].astype(f32),                      # 10
    ]).reshape(542, 1)

    mats = [m.astype(bf16) for m in (k1, k2, pr1, pc1, pr2, pc2, w3c, w4t, w5t)]
    return tuple(mats) + (biases,)


# ----------------------------------------------------------------------------
# Full forward pass (StudentNet / LeNet-5)
# ----------------------------------------------------------------------------
def student_net_forward(x_nchw, params, block_b=8):
    n = x_nchw.shape[0]
    B = int(block_b)
    g = max(1, -(-n // B))
    npad = g * B

    # (N,1,28,28) -> padded (32,32) images laid out as (g, 32, 32*B), col = j*B + b
    xp = jnp.pad(x_nchw[:, 0].astype(jnp.float32), ((0, npad - n), (2, 2), (2, 2)))
    xp = xp.reshape(g, B, 32, 32).transpose(0, 2, 3, 1).reshape(g, 32, 32 * B)

    consts = _prepare_constants(params, B)

    in_specs = [pl.BlockSpec((None, 32, 32 * B), lambda i: (i, 0, 0))]
    in_specs += [pl.BlockSpec(c.shape, lambda i: (0, 0)) for c in consts]

    out = pl.pallas_call(
        functools.partial(_lenet_kernel, block_b=B),
        out_shape=jax.ShapeDtypeStruct((g, 10, B), jnp.float32),
        grid_spec=pltpu.PrefetchScalarGridSpec(
            num_scalar_prefetch=0,
            grid=(g,),
            in_specs=in_specs,
            out_specs=pl.BlockSpec((None, 10, B), lambda i: (i, 0, 0)),
        ),
        compiler_params=pltpu.CompilerParams(
            dimension_semantics=("parallel",),
        ),
    )(xp, *consts)

    return out.transpose(0, 2, 1).reshape(npad, 10)[:n]


# ----------------------------------------------------------------------------
# Pure-JAX reference (mirrors the torch module) for validation
# ----------------------------------------------------------------------------
def reference_forward(x, p):
    dn = ("NCHW", "OIHW", "NCHW")
    hp = jax.lax.Precision.HIGHEST
    y = jax.lax.conv_general_dilated(
        x, p["w1"], (1, 1), ((2, 2), (2, 2)), dimension_numbers=dn, precision=hp
    ) + p["b1"][None, :, None, None]
    y = jnp.tanh(y)
    y = jax.lax.reduce_window(y, 0.0, jax.lax.add, (1, 1, 2, 2), (1, 1, 2, 2), "VALID") / 4.0
    y = jax.lax.conv_general_dilated(
        y, p["w2"], (1, 1), "VALID", dimension_numbers=dn, precision=hp
    ) + p["b2"][None, :, None, None]
    y = jnp.tanh(y)
    y = jax.lax.reduce_window(y, 0.0, jax.lax.add, (1, 1, 2, 2), (1, 1, 2, 2), "VALID") / 4.0
    y = y.reshape(y.shape[0], -1)
    y = jnp.tanh(jnp.dot(y, p["w3"], precision=hp) + p["b3"])
    y = jnp.tanh(jnp.dot(y, p["w4"], precision=hp) + p["b4"])
    return jnp.dot(y, p["w5"], precision=hp) + p["b5"]


def init_params(key):
    ks = jax.random.split(key, 10)

    def u(k, shape, fan_in):
        bound = 1.0 / jnp.sqrt(fan_in)
        return jax.random.uniform(k, shape, jnp.float32, -bound, bound)

    return {
        # Conv weights in torch OIHW layout
        "w1": u(ks[0], (6, 1, 5, 5), 1 * 5 * 5),
        "b1": u(ks[1], (6,), 1 * 5 * 5),
        "w2": u(ks[2], (16, 6, 5, 5), 6 * 5 * 5),
        "b2": u(ks[3], (16,), 6 * 5 * 5),
        # Linear weights stored as (in, out)  (== torch weight.T)
        "w3": u(ks[4], (400, 120), 400),
        "b3": u(ks[5], (120,), 400),
        "w4": u(ks[6], (120, 84), 120),
        "b4": u(ks[7], (84,), 120),
        "w5": u(ks[8], (84, 10), 84),
        "b5": u(ks[9], (10,), 84),
    }


if __name__ == "__main__":
    key = jax.random.PRNGKey(0)
    k_param, k_x = jax.random.split(key)
    params = init_params(k_param)

    # MNIST-shaped input: 16 images of 1x28x28 -> 2 grid steps of 8 images each
    # (grid length >= 2 so both v7x TensorCores get work).
    x = jax.random.normal(k_x, (16, 1, 28, 28), dtype=jnp.float32)

    fwd = jax.jit(student_net_forward)
    out = jax.block_until_ready(fwd(x, params))
    assert out.shape == (16, 10), out.shape

    ref = jax.block_until_ready(reference_forward(x, params))
    max_err = float(jnp.max(jnp.abs(out - ref)))
    # bf16 MXU operands with f32 accumulation -> ~1e-2-level absolute error.
    assert jnp.allclose(out, ref, atol=2e-2, rtol=2e-2), max_err

    print("KERNEL_OK")
</pallas_src>

<mosaic_0001>
module attributes {stable_mosaic.version = 11 : i64} {
  func.func @_lenet_kernel(%arg0: i32, %arg1: memref<1x32x256xf32, #tpu.memory_space<vmem>>, %arg2: memref<168x160xbf16, #tpu.memory_space<vmem>>, %arg3: memref<160x480xbf16, #tpu.memory_space<vmem>>, %arg4: memref<96x168xbf16, #tpu.memory_space<vmem>>, %arg5: memref<224x112xbf16, #tpu.memory_space<vmem>>, %arg6: memref<80x160xbf16, #tpu.memory_space<vmem>>, %arg7: memref<80x40xbf16, #tpu.memory_space<vmem>>, %arg8: memref<120x400xbf16, #tpu.memory_space<vmem>>, %arg9: memref<84x120xbf16, #tpu.memory_space<vmem>>, %arg10: memref<10x84xbf16, #tpu.memory_space<vmem>>, %arg11: memref<542x1xf32, #tpu.memory_space<vmem>>, %arg12: memref<1x10x8xf32, #tpu.memory_space<vmem>>) attributes {dimension_semantics = [#tpu.dimension_semantics<parallel>], iteration_bounds = array<i64: 2>, scalar_prefetch = 0 : i64, scratch_operands = 0 : i64, tpu.core_type = #tpu.core_type<tc>, window_params = [{transform_indices = @transform_0, window_bounds = array<i64: 1, 32, 256>}, {pipeline_mode = #tpu.pipeline_mode<synchronous>, transform_indices = @transform_1, window_bounds = array<i64: 168, 160>}, {pipeline_mode = #tpu.pipeline_mode<synchronous>, transform_indices = @transform_2, window_bounds = array<i64: 160, 480>}, {pipeline_mode = #tpu.pipeline_mode<synchronous>, transform_indices = @transform_3, window_bounds = array<i64: 96, 168>}, {pipeline_mode = #tpu.pipeline_mode<synchronous>, transform_indices = @transform_4, window_bounds = array<i64: 224, 112>}, {pipeline_mode = #tpu.pipeline_mode<synchronous>, transform_indices = @transform_5, window_bounds = array<i64: 80, 160>}, {pipeline_mode = #tpu.pipeline_mode<synchronous>, transform_indices = @transform_6, window_bounds = array<i64: 80, 40>}, {pipeline_mode = #tpu.pipeline_mode<synchronous>, transform_indices = @transform_7, window_bounds = array<i64: 120, 400>}, {pipeline_mode = #tpu.pipeline_mode<synchronous>, transform_indices = @transform_8, window_bounds = array<i64: 84, 120>}, {pipeline_mode = #tpu.pipeline_mode<synchronous>, transform_indices = @transform_9, window_bounds = array<i64: 10, 84>}, {pipeline_mode = #tpu.pipeline_mode<synchronous>, transform_indices = @transform_10, window_bounds = array<i64: 542, 1>}, {transform_indices = @transform_11, window_bounds = array<i64: 1, 10, 8>}]} {
    %c0 = arith.constant 0 : index
    %c0_0 = arith.constant 0 : index
    %0 = vector.load %arg11[%c0, %c0_0] : memref<542x1xf32, #tpu.memory_space<vmem>>, vector<542x1xf32>
    %1 = vector.extract_strided_slice %0 {offsets = [0, 0], sizes = [168, 1], strides = [1, 1]} : vector<542x1xf32> to vector<168x1xf32>
    %2 = vector.extract_strided_slice %0 {offsets = [168, 0], sizes = [160, 1], strides = [1, 1]} : vector<542x1xf32> to vector<160x1xf32>
    %3 = vector.extract_strided_slice %0 {offsets = [328, 0], sizes = [120, 1], strides = [1, 1]} : vector<542x1xf32> to vector<120x1xf32>
    %4 = vector.extract_strided_slice %0 {offsets = [448, 0], sizes = [84, 1], strides = [1, 1]} : vector<542x1xf32> to vector<84x1xf32>
    %5 = vector.extract_strided_slice %0 {offsets = [532, 0], sizes = [10, 1], strides = [1, 1]} : vector<542x1xf32> to vector<10x1xf32>
    %c0_1 = arith.constant 0 : index
    %c0_2 = arith.constant 0 : index
    %c0_3 = arith.constant 0 : index
    %6 = vector.load %arg1[%c0_1, %c0_2, %c0_3] : memref<1x32x256xf32, #tpu.memory_space<vmem>>, vector<1x32x256xf32>
    %7 = vector.shape_cast %6 : vector<1x32x256xf32> to vector<32x256xf32>
    %8 = arith.truncf %7 : vector<32x256xf32> to vector<32x256xbf16>
    %9 = vector.extract_strided_slice %8 {offsets = [0, 0], sizes = [32, 224], strides = [1, 1]} : vector<32x256xbf16> to vector<32x224xbf16>
    %10 = vector.extract_strided_slice %8 {offsets = [0, 8], sizes = [32, 224], strides = [1, 1]} : vector<32x256xbf16> to vector<32x224xbf16>
    %11 = vector.extract_strided_slice %8 {offsets = [0, 16], sizes = [32, 224], strides = [1, 1]} : vector<32x256xbf16> to vector<32x224xbf16>
    %12 = vector.extract_strided_slice %8 {offsets = [0, 24], sizes = [32, 224], strides = [1, 1]} : vector<32x256xbf16> to vector<32x224xbf16>
    %13 = vector.extract_strided_slice %8 {offsets = [0, 32], sizes = [32, 224], strides = [1, 1]} : vector<32x256xbf16> to vector<32x224xbf16>
    %14 = tpu.concatenate %9, %10, %11, %12, %13 in 0 : vector<32x224xbf16>, vector<32x224xbf16>, vector<32x224xbf16>, vector<32x224xbf16>, vector<32x224xbf16> -> vector<160x224xbf16>
    %c0_4 = arith.constant 0 : index
    %c0_5 = arith.constant 0 : index
    %15 = vector.load %arg2[%c0_4, %c0_5] : memref<168x160xbf16, #tpu.memory_space<vmem>>, vector<168x160xbf16>
    %cst = arith.constant dense<0.000000e+00> : vector<168x224xf32>
    %16 = tpu.matmul %15, %14, %cst {dimension_numbers = #tpu.dot_dimension_numbers<[1], [0], [0], [1], [0, 0, 1, 1], [], []>} : vector<168x160xbf16>, vector<160x224xbf16>, vector<168x224xf32> -> vector<168x224xf32>
    %17 = vector.broadcast %1 : vector<168x1xf32> to vector<168x224xf32>
    %18 = arith.addf %16, %17 : vector<168x224xf32>
    %19 = math.tanh %18 : vector<168x224xf32>
    %c0_6 = arith.constant 0 : index
    %c0_7 = arith.constant 0 : index
    %20 = vector.load %arg4[%c0_6, %c0_7] : memref<96x168xbf16, #tpu.memory_space<vmem>>, vector<96x168xbf16>
    %21 = arith.truncf %19 : vector<168x224xf32> to vector<168x224xbf16>
    %cst_8 = arith.constant dense<0.000000e+00> : vector<96x224xf32>
    %22 = tpu.matmul %20, %21, %cst_8 {dimension_numbers = #tpu.dot_dimension_numbers<[1], [0], [0], [1], [0, 0, 1, 1], [], []>} : vector<96x168xbf16>, vector<168x224xbf16>, vector<96x224xf32> -> vector<96x224xf32>
    %23 = arith.truncf %22 : vector<96x224xf32> to vector<96x224xbf16>
    %c0_9 = arith.constant 0 : index
    %c0_10 = arith.constant 0 : index
    %24 = vector.load %arg5[%c0_9, %c0_10] : memref<224x112xbf16, #tpu.memory_space<vmem>>, vector<224x112xbf16>
    %cst_11 = arith.constant dense<0.000000e+00> : vector<96x112xf32>
    %25 = tpu.matmul %23, %24, %cst_11 {dimension_numbers = #tpu.dot_dimension_numbers<[1], [0], [0], [1], [0, 0, 1, 1], [], []>} : vector<96x224xbf16>, vector<224x112xbf16>, vector<96x112xf32> -> vector<96x112xf32>
    %26 = arith.truncf %25 : vector<96x112xf32> to vector<96x112xbf16>
    %27 = vector.extract_strided_slice %26 {offsets = [0, 0], sizes = [96, 80], strides = [1, 1]} : vector<96x112xbf16> to vector<96x80xbf16>
    %28 = vector.extract_strided_slice %26 {offsets = [0, 8], sizes = [96, 80], strides = [1, 1]} : vector<96x112xbf16> to vector<96x80xbf16>
    %29 = vector.extract_strided_slice %26 {offsets = [0, 16], sizes = [96, 80], strides = [1, 1]} : vector<96x112xbf16> to vector<96x80xbf16>
    %30 = vector.extract_strided_slice %26 {offsets = [0, 24], sizes = [96, 80], strides = [1, 1]} : vector<96x112xbf16> to vector<96x80xbf16>
    %31 = vector.extract_strided_slice %26 {offsets = [0, 32], sizes = [96, 80], strides = [1, 1]} : vector<96x112xbf16> to vector<96x80xbf16>
    %32 = tpu.concatenate %27, %28, %29, %30, %31 in 0 : vector<96x80xbf16>, vector<96x80xbf16>, vector<96x80xbf16>, vector<96x80xbf16>, vector<96x80xbf16> -> vector<480x80xbf16>
    %c0_12 = arith.constant 0 : index
    %c0_13 = arith.constant 0 : index
    %33 = vector.load %arg3[%c0_12, %c0_13] : memref<160x480xbf16, #tpu.memory_space<vmem>>, vector<160x480xbf16>
    %cst_14 = arith.constant dense<0.000000e+00> : vector<160x80xf32>
    %34 = tpu.matmul %33, %32, %cst_14 {dimension_numbers = #tpu.dot_dimension_numbers<[1], [0], [0], [1], [0, 0, 1, 1], [], []>} : vector<160x480xbf16>, vector<480x80xbf16>, vector<160x80xf32> -> vector<160x80xf32>
    %35 = vector.broadcast %2 : vector<160x1xf32> to vector<160x80xf32>
    %36 = arith.addf %34, %35 : vector<160x80xf32>
    %37 = math.tanh %36 : vector<160x80xf32>
    %c0_15 = arith.constant 0 : index
    %c0_16 = arith.constant 0 : index
    %38 = vector.load %arg6[%c0_15, %c0_16] : memref<80x160xbf16, #tpu.memory_space<vmem>>, vector<80x160xbf16>
    %39 = arith.truncf %37 : vector<160x80xf32> to vector<160x80xbf16>
    %cst_17 = arith.constant dense<0.000000e+00> : vector<80x80xf32>
    %40 = tpu.matmul %38, %39, %cst_17 {dimension_numbers = #tpu.dot_dimension_numbers<[1], [0], [0], [1], [0, 0, 1, 1], [], []>} : vector<80x160xbf16>, vector<160x80xbf16>, vector<80x80xf32> -> vector<80x80xf32>
    %41 = arith.truncf %40 : vector<80x80xf32> to vector<80x80xbf16>
    %c0_18 = arith.constant 0 : index
    %c0_19 = arith.constant 0 : index
    %42 = vector.load %arg7[%c0_18, %c0_19] : memref<80x40xbf16, #tpu.memory_space<vmem>>, vector<80x40xbf16>
    %cst_20 = arith.constant dense<0.000000e+00> : vector<80x40xf32>
    %43 = tpu.matmul %41, %42, %cst_20 {dimension_numbers = #tpu.dot_dimension_numbers<[1], [0], [0], [1], [0, 0, 1, 1], [], []>} : vector<80x80xbf16>, vector<80x40xbf16>, vector<80x40xf32> -> vector<80x40xf32>
    %44 = arith.truncf %43 : vector<80x40xf32> to vector<80x40xbf16>
    %45 = vector.extract_strided_slice %44 {offsets = [0, 0], sizes = [80, 8], strides = [1, 1]} : vector<80x40xbf16> to vector<80x8xbf16>
    %46 = vector.extract_strided_slice %44 {offsets = [0, 8], sizes = [80, 8], strides = [1, 1]} : vector<80x40xbf16> to vector<80x8xbf16>
    %47 = vector.extract_strided_slice %44 {offsets = [0, 16], sizes = [80, 8], strides = [1, 1]} : vector<80x40xbf16> to vector<80x8xbf16>
    %48 = vector.extract_strided_slice %44 {offsets = [0, 24], sizes = [80, 8], strides = [1, 1]} : vector<80x40xbf16> to vector<80x8xbf16>
    %49 = vector.extract_strided_slice %44 {offsets = [0, 32], sizes = [80, 8], strides = [1, 1]} : vector<80x40xbf16> to vector<80x8xbf16>
    %50 = tpu.concatenate %45, %46, %47, %48, %49 in 0 : vector<80x8xbf16>, vector<80x8xbf16>, vector<80x8xbf16>, vector<80x8xbf16>, vector<80x8xbf16> -> vector<400x8xbf16>
    %c0_21 = arith.constant 0 : index
    %c0_22 = arith.constant 0 : index
    %51 = vector.load %arg8[%c0_21, %c0_22] : memref<120x400xbf16, #tpu.memory_space<vmem>>, vector<120x400xbf16>
    %cst_23 = arith.constant dense<0.000000e+00> : vector<120x8xf32>
    %52 = tpu.matmul %51, %50, %cst_23 {dimension_numbers = #tpu.dot_dimension_numbers<[1], [0], [0], [1], [0, 0, 1, 1], [], []>} : vector<120x400xbf16>, vector<400x8xbf16>, vector<120x8xf32> -> vector<120x8xf32>
    %53 = vector.broadcast %3 : vector<120x1xf32> to vector<120x8xf32>
    %54 = arith.addf %52, %53 : vector<120x8xf32>
    %55 = math.tanh %54 : vector<120x8xf32>
    %c0_24 = arith.constant 0 : index
    %c0_25 = arith.constant 0 : index
    %56 = vector.load %arg9[%c0_24, %c0_25] : memref<84x120xbf16, #tpu.memory_space<vmem>>, vector<84x120xbf16>
    %57 = arith.truncf %55 : vector<120x8xf32> to vector<120x8xbf16>
    %cst_26 = arith.constant dense<0.000000e+00> : vector<84x8xf32>
    %58 = tpu.matmul %56, %57, %cst_26 {dimension_numbers = #tpu.dot_dimension_numbers<[1], [0], [0], [1], [0, 0, 1, 1], [], []>} : vector<84x120xbf16>, vector<120x8xbf16>, vector<84x8xf32> -> vector<84x8xf32>
    %59 = vector.broadcast %4 : vector<84x1xf32> to vector<84x8xf32>
    %60 = arith.addf %58, %59 : vector<84x8xf32>
    %61 = math.tanh %60 : vector<84x8xf32>
    %c0_27 = arith.constant 0 : index
    %c0_28 = arith.constant 0 : index
    %62 = vector.load %arg10[%c0_27, %c0_28] : memref<10x84xbf16, #tpu.memory_space<vmem>>, vector<10x84xbf16>
    %63 = arith.truncf %61 : vector<84x8xf32> to vector<84x8xbf16>
    %cst_29 = arith.constant dense<0.000000e+00> : vector<10x8xf32>
    %64 = tpu.matmul %62, %63, %cst_29 {dimension_numbers = #tpu.dot_dimension_numbers<[1], [0], [0], [1], [0, 0, 1, 1], [], []>} : vector<10x84xbf16>, vector<84x8xbf16>, vector<10x8xf32> -> vector<10x8xf32>
    %65 = vector.broadcast %5 : vector<10x1xf32> to vector<10x8xf32>
    %66 = arith.addf %64, %65 : vector<10x8xf32>
    %c0_30 = arith.constant 0 : index
    %c0_31 = arith.constant 0 : index
    %c0_32 = arith.constant 0 : index
    %67 = vector.load %arg12[%c0_30, %c0_31, %c0_32] : memref<1x10x8xf32, #tpu.memory_space<vmem>>, vector<1x10x8xf32>
    %68 = vector.shape_cast %67 : vector<1x10x8xf32> to vector<10x8xf32>
    %69 = vector.shape_cast %66 : vector<10x8xf32> to vector<1x10x8xf32>
    tpu.vector_store %arg12[%c0_30, %c0_31, %c0_32], %69 {strides = array<i32>} : memref<1x10x8xf32, #tpu.memory_space<vmem>>, vector<1x10x8xf32>,
    return
  }
  func.func @transform_0(%arg0: i32) -> (i32, i32, i32) {
    %c0_i32 = arith.constant 0 : i32
    %c0_i32_0 = arith.constant 0 : i32
    %c0_i32_1 = arith.constant 0 : i32
    return %arg0, %c0_i32, %c0_i32_0 : i32, i32, i32
  }
  func.func @transform_1(%arg0: i32) -> (i32, i32) {
    %c0_i32 = arith.constant 0 : i32
    %c0_i32_0 = arith.constant 0 : i32
    %c0_i32_1 = arith.constant 0 : i32
    return %c0_i32, %c0_i32_0 : i32, i32
  }
  func.func @transform_2(%arg0: i32) -> (i32, i32) {
    %c0_i32 = arith.constant 0 : i32
    %c0_i32_0 = arith.constant 0 : i32
    %c0_i32_1 = arith.constant 0 : i32
    return %c0_i32, %c0_i32_0 : i32, i32
  }
  func.func @transform_3(%arg0: i32) -> (i32, i32) {
    %c0_i32 = arith.constant 0 : i32
    %c0_i32_0 = arith.constant 0 : i32
    %c0_i32_1 = arith.constant 0 : i32
    return %c0_i32, %c0_i32_0 : i32, i32
  }
  func.func @transform_4(%arg0: i32) -> (i32, i32) {
    %c0_i32 = arith.constant 0 : i32
    %c0_i32_0 = arith.constant 0 : i32
    %c0_i32_1 = arith.constant 0 : i32
    return %c0_i32, %c0_i32_0 : i32, i32
  }
  func.func @transform_5(%arg0: i32) -> (i32, i32) {
    %c0_i32 = arith.constant 0 : i32
    %c0_i32_0 = arith.constant 0 : i32
    %c0_i32_1 = arith.constant 0 : i32
    return %c0_i32, %c0_i32_0 : i32, i32
  }
  func.func @transform_6(%arg0: i32) -> (i32, i32) {
    %c0_i32 = arith.constant 0 : i32
    %c0_i32_0 = arith.constant 0 : i32
    %c0_i32_1 = arith.constant 0 : i32
    return %c0_i32, %c0_i32_0 : i32, i32
  }
  func.func @transform_7(%arg0: i32) -> (i32, i32) {
    %c0_i32 = arith.constant 0 : i32
    %c0_i32_0 = arith.constant 0 : i32
    %c0_i32_1 = arith.constant 0 : i32
    return %c0_i32, %c0_i32_0 : i32, i32
  }
  func.func @transform_8(%arg0: i32) -> (i32, i32) {
    %c0_i32 = arith.constant 0 : i32
    %c0_i32_0 = arith.constant 0 : i32
    %c0_i32_1 = arith.constant 0 : i32
    return %c0_i32, %c0_i32_0 : i32, i32
  }
  func.func @transform_9(%arg0: i32) -> (i32, i32) {
    %c0_i32 = arith.constant 0 : i32
    %c0_i32_0 = arith.constant 0 : i32
    %c0_i32_1 = arith.constant 0 : i32
    return %c0_i32, %c0_i32_0 : i32, i32
  }
  func.func @transform_10(%arg0: i32) -> (i32, i32) {
    %c0_i32 = arith.constant 0 : i32
    %c0_i32_0 = arith.constant 0 : i32
    %c0_i32_1 = arith.constant 0 : i32
    return %c0_i32, %c0_i32_0 : i32, i32
  }
  func.func @transform_11(%arg0: i32) -> (i32, i32, i32) {
    %c0_i32 = arith.constant 0 : i32
    %c0_i32_0 = arith.constant 0 : i32
    %c0_i32_1 = arith.constant 0 : i32
    return %arg0, %c0_i32, %c0_i32_0 : i32, i32, i32
  }
}

</mosaic_0001>

<bundles_post_ra>
// kernel: student_net_forward.1
= control target key start
LH: loop header
LB: loop body
LE: loop exit
PB: predicated region body
PF: predicated region fallthrough
CT: control target
= control target key end

     0   :  { %s4202_s17 = smov 0   ;;  %s5121_s0 = inlined_call_operand.vmem [shape: f32[2,32,256], index: 0, kind: input, shape index: {}]   ;;  %s5122_s1 = inlined_call_operand.vmem [shape: bf16[168,160], index: 1, kind: input, shape index: {}]   ;;  %s5123_s2 = inlined_call_operand.vmem [shape: bf16[160,480], index: 2, kind: input, shape index: {}]   ;;  %s5124_s3 = inlined_call_operand.vmem [shape: bf16[96,168], index: 3, kind: input, shape index: {}]   ;;  %s5125_s4 = inlined_call_operand.vmem [shape: bf16[224,112], index: 4, kind: input, shape index: {}]   ;;  %s5126_s5 = inlined_call_operand.vmem [shape: bf16[80,160], index: 5, kind: input, shape index: {}]   ;;  %s5127_s6 = inlined_call_operand.vmem [shape: bf16[80,40], index: 6, kind: input, shape index: {}]   ;;  %s5128_s7 = inlined_call_operand.vmem [shape: bf16[120,400], index: 7, kind: input, shape index: {}]   ;;  %s5129_s8 = inlined_call_operand.vmem [shape: bf16[84,120], index: 8, kind: input, shape index: {}]   ;;  %s5130_s9 = inlined_call_operand.vmem [shape: bf16[10,84], index: 9, kind: input, shape index: {}]   ;;  %s5131_s10 = inlined_call_operand.vmem [shape: f32[542,1], index: 10, kind: input, shape index: {}]   ;;  %s5132_s11 = inlined_call_operand.vmem [shape: f32[2,10,8], index: 11, kind: output, shape index: {}]  }
   0x1 LB: > { %s3277_s18 = sadd.s32 4294967295, %s4133_s17   ;;  %p3281_p0 = scmp.ge.s32.totalorder %s4133_s17, 1  ;;  %s4133_s17 = sphi %s4202_s17, %s21_s17  }
   0x2   : > { %p337_p1 = scmp.lt.s32.totalorder %s4133_s17, 3 }
   0x4   : > { %p338_p2 = pnand %p3281_p0, %p337_p1 }
   0x5   : > { %p377_p3 = scmp.lt.s32.totalorder (!%p338_p2), %s3277_s18, 1  ;;  %s4135_s23 = smov (!%p338_p2), 120   ;;  %v3756_v12 = vld [vmem:[%s5122_s1 + $0x4] ss:$8 sps:$4 sm:$0xff] (!%p338_p2)   ;;  %vm754_vm0 = vcmask (!%p338_p2), 261120   ;;  %v4139_v15 = vmov (!%p338_p2), 0  }
   0x6   : > { %341 = sbr.rel (%p338_p2) target bundleno = 2798 (0xaee), region = 64  ;;  %s4136_s24 = smov (!%p338_p2), 112   ;;  %3308 = vmatprep.mubr.msk.bf16.mxu0 (!%p338_p2), %vm754_vm0, %v3756_v12  ;;  %v388_v13 = vld [vmem:[%s5131_s10] sm:$0xff] (!%p338_p2)  ;;  %v389_v14 = vld [vmem:[%s5131_s10 + $0x8] sm:$0xff] (!%p338_p2)  ;;  %3752 = vset.pattern.permute.xlu0 (!%p338_p2), %v4139_v15  ;;  %v390_v16 = vld [vmem:[%s5131_s10 + $0x10] sm:$0xff] (!%p338_p2)  ;;  %vm480_vm1 = vcmask (!%p338_p2), 982016  }
   0x7   : > { %s4137_s25 = smov (!%p338_p2), 104   ;;  %s4138_s28 = smov (!%p338_p2), 96   ;;  %3753 = vset.pattern.permute.xlu1 (!%p338_p2), %v4139_v15  ;;  %v391_v17 = vld [vmem:[%s5131_s10 + $0x18] sm:$0xff] (!%p338_p2)  ;;  %v392_v18 = vld [vmem:[%s5131_s10 + $0x20] sm:$0xff] (!%p338_p2)  ;;  %v393_v19 = vld [vmem:[%s5131_s10 + $0x28] sm:$0xff] (!%p338_p2)  ;;  %vm495_vm2 = vcmask (!%p338_p2), 916480  }
   0x8   : > { %v394_v22 = vld [vmem:[%s5131_s10 + $0x30] sm:$0xff] (!%p338_p2)  ;;  %v395_v23 = vld [vmem:[%s5131_s10 + $0x38] sm:$0xff] (!%p338_p2)  ;;  %v396_v26 = vld [vmem:[%s5131_s10 + $0x40] sm:$0xff] (!%p338_p2)  ;;  %vm510_vm3 = vcmask (!%p338_p2), 850944   ;;  %vm525_vm4 = vcmask (!%p338_p2), 785408   ;;  %vm1059_vm5 = vcmask (!%p338_p2), 326656  }
   0x9   : > { %v397_v28 = vld [vmem:[%s5131_s10 + $0x48] sm:$0xff] (!%p338_p2)  ;;  %v398_v31 = vld [vmem:[%s5131_s10 + $0x50] sm:$0xff] (!%p338_p2)  ;;  %v399_v33 = vld [vmem:[%s5131_s10 + $0x58] sm:$0xff] (!%p338_p2)  ;;  %vm1078_vm6 = vcmask (!%p338_p2), 1043456   ;;  %vm4141_vm7 = vmmov (!%p338_p2), 0   ;;  %vm2290_vm8 = vcmask (!%p338_p2), 654336  }
   0xa   : > { %v400_v37 = vld [vmem:[%s5131_s10 + $0x60] sm:$0xff] (!%p338_p2)  ;;  %v401_v38 = vld [vmem:[%s5131_s10 + $0x68] sm:$0xff] (!%p338_p2)  ;;  %v402_v42 = vld [vmem:[%s5131_s10 + $0x70] sm:$0xff] (!%p338_p2)  ;;  %vm2700_vm9 = vcmask (!%p338_p2), 130048   ;;  %vm3173_vm10 = vcmask (!%p338_p2), 1041408   ;;  %vm3169_vm11 = vcmask (!%p338_p2), 687104  }
   0xb   : > { %v403_v43 = vld [vmem:[%s5131_s10 + $0x78] sm:$0xff] (!%p338_p2)  ;;  %v404_v47 = vld [vmem:[%s5131_s10 + $0x80] sm:$0xff] (!%p338_p2)  ;;  %v405_v48 = vld [vmem:[%s5131_s10 + $0x88] sm:$0xff] (!%p338_p2)  ;;  %vm3218_vm12 = vcmask (!%p338_p2), 64512   ;;  %vm3220_vm13 = vcmask (!%p338_p2), 58368  }
   0xc   : > { %v406_v52 = vld [vmem:[%s5131_s10 + $0x90] sm:$0xff] (!%p338_p2)  ;;  %v407_v53 = vld [vmem:[%s5131_s10 + $0x98] sm:$0xff] (!%p338_p2)  ;;  %v408_v57 = vld [vmem:[%s5131_s10 + $0xa0] sm:$0xff] (!%p338_p2) }
   0xd   : > { %s5134_s18 = smov (!%p377_p3, %s3277_s18), 1  ;;  %v3754_v59 = vld [vmem:[%s5122_s1] ss:$8 sps:$4 sm:$0xff]   ;;  %v3757_v60 = vld [vmem:[%s5122_s1 + $0x14] ss:$8 sps:$4 sm:$0xff]  }
   0xe   : > { %s3489_s19 = sshll.u32 %s5134_s18, 6  ;;  %v3759_v61 = vld [vmem:[%s5122_s1 + $0x10] ss:$8 sps:$4 sm:$0xff]   ;;  %v3760_v62 = vld [vmem:[%s5122_s1 + $0x24] ss:$8 sps:$4 sm:$0xff]  }
   0xf   : > { %s381_s22 = scalar_lea.vmem %s5121_s0, %s3489_s19  ;;  %v3762_v63 = vld [vmem:[%s5122_s1 + $0x20] ss:$8 sps:$4 sm:$0xff]   ;;  %v3781_v12 = vld [vmem:[%s5122_s1 + $0x94] ss:$8 sps:$4 sm:$0xff]  }
  0x10   : > { %v460_v0 = vld [vmem:[%s381_s22 + $0x20] sm:$0xff]  ;;  %v462_v1 = vld [vmem:[%s381_s22 + $0x30] sm:$0xff]  ;;  %v461_v5 = vld [vmem:[%s381_s22 + $0x28] sm:$0xff] }
  0x11   : > { %v456_v2 = vld [vmem:[%s381_s22] sm:$0xff]  ;;  %v466_v3 = vpack.c.bf16 %v462_v1, %v460_v0  ;;  %v458_v4 = vld [vmem:[%s381_s22 + $0x10] sm:$0xff]  ;;  %v463_v6 = vld [vmem:[%s381_s22 + $0x38] sm:$0xff] }
  0x12   : > { %v464_v7 = vpack.c.bf16 %v458_v4, %v456_v2  ;;  %v457_v8 = vld [vmem:[%s381_s22 + $0x8] sm:$0xff]  ;;  %v459_v9 = vld [vmem:[%s381_s22 + $0x18] sm:$0xff]  ;;  %v467_v10 = vpack.c.bf16 %v463_v6, %v461_v5 }
  0x13   : > { %476 = vrot.lane.b32.xlu1 %v466_v3, %s4135_s23  ;;  %v465_v11 = vpack.c.bf16 %v459_v9, %v457_v8  ;;  %v3763_v0 = vld [vmem:[%s5122_s1 + $0x34] ss:$8 sps:$4 sm:$0xff]   ;;  %v3765_v1 = vld [vmem:[%s5122_s1 + $0x30] ss:$8 sps:$4 sm:$0xff]   ;;  %v3766_v2 = vld [vmem:[%s5122_s1 + $0x44] ss:$8 sps:$4 sm:$0xff]  }
  0x14   : > { %472 = vrot.lane.b32.xlu0 %v464_v7, %s4135_s23  ;;  %v3769_v4 = vld [vmem:[%s5122_s1 + $0x54] ss:$8 sps:$4 sm:$0xff]   ;;  %v3771_v5 = vld [vmem:[%s5122_s1 + $0x50] ss:$8 sps:$4 sm:$0xff]   ;;  %v3772_v6 = vld [vmem:[%s5122_s1 + $0x64] ss:$8 sps:$4 sm:$0xff]  }
  0x15   : > { %788 = vmatprep.subr.bf16.mxu0 %v465_v11  ;;  %v3775_v8 = vld [vmem:[%s5122_s1 + $0x74] ss:$8 sps:$4 sm:$0xff]   ;;  %v3777_v9 = vld [vmem:[%s5122_s1 + $0x70] ss:$8 sps:$4 sm:$0xff]  }
  0x16   : > { %789 = vmatpush1.bf16.msra.mxu0 %v464_v7 }
  0x17   : > { %478 = vrot.lane.b32.xlu1 %v467_v10, %s4135_s23  ;;  %790 = vmatprep.subr.bf16.mxu0 %v467_v10 }
  0x18   : > { %474 = vrot.lane.b32.xlu0 %v465_v11, %s4135_s23 }
  0x1a   : > { %791 = vmatpush1.bf16.msra.mxu0 %v466_v3 }
  0x1b   : > { %489 = vrot.lane.b32.xlu1 %v465_v11, %s4136_s24 }
  0x1c   : > { %487 = vrot.lane.b32.xlu0 %v464_v7, %s4136_s24 }
  0x1f   : > { %493 = vrot.lane.b32.xlu1 %v467_v10, %s4136_s24 }
  0x20   : > { %491 = vrot.lane.b32.xlu0 %v466_v3, %s4136_s24 }
  0x23   : > { %504 = vrot.lane.b32.xlu1 %v465_v11, %s4137_s25 }
  0x24   : > { %502 = vrot.lane.b32.xlu0 %v464_v7, %s4137_s25 }
  0x27   : > { %508 = vrot.lane.b32.xlu1 %v467_v10, %s4137_s25 }
  0x28   : > { %506 = vrot.lane.b32.xlu0 %v466_v3, %s4137_s25 }
  0x2b   : > { %519 = vrot.lane.b32.xlu1 %v465_v11, %s4138_s28  ;;  %v3780_v11 = vld [vmem:[%s5122_s1 + $0x80] ss:$8 sps:$4 sm:$0xff]  }
  0x2c   : > { %517 = vrot.lane.b32.xlu0 %v464_v7, %s4138_s28  ;;  %v3774_v7 = vld [vmem:[%s5122_s1 + $0x60] ss:$8 sps:$4 sm:$0xff]  }
  0x2f   : > { %523 = vrot.lane.b32.xlu1 %v467_v10, %s4138_s28  ;;  %v3778_v10 = vld [vmem:[%s5122_s1 + $0x84] ss:$8 sps:$4 sm:$0xff]  }
  0x30   : > { %521 = vrot.lane.b32.xlu0 %v466_v3, %s4138_s28  ;;  %v3768_v3 = vld [vmem:[%s5122_s1 + $0x40] ss:$8 sps:$4 sm:$0xff]  }
  0x33   : > { %560 = vperm.xlu1 %3753, %v389_v14   ;;  %v3783_v14 = vld [vmem:[%s5122_s1 + $0x90] ss:$8 sps:$4 sm:$0xff]  }
  0x34   : > { %555 = vperm.xlu0 %3752, %v388_v13   ;;  %v552_v13 = vld [vmem:[%s5122_s1 + $0xa0] sm:$0xff] }
  0x37   : > { %565 = vperm.xlu1 %3753, %v390_v16   ;;  %v3307_v16 = vcombine.high %v552_v13, %v552_v13 }
  0x38   : > { %570 = vperm.xlu0 %3752, %v391_v17   ;;  %v3306_v17 = vcombine.low %v552_v13, %v552_v13 }
  0x3b   : > { %575 = vperm.xlu1 %3753, %v392_v18   ;;  %v3788_v18 = vld [vmem:[%s5124_s3 + $0x4] ss:$8 sps:$4 sm:$0xff]  }
  0x3c   : > { %580 = vperm.xlu0 %3752, %v393_v19   ;;  %3332 = vmatprep.mubr.msk.bf16.mxu1 %vm1059_vm5, %v3788_v18 }
  0x3f   : > { %585 = vperm.xlu1 %3753, %v394_v22  }
  0x40   : > { %590 = vperm.xlu0 %3752, %v395_v23  }
  0x43   : > { %595 = vperm.xlu1 %3753, %v396_v26  }
  0x44   : > { %600 = vperm.xlu0 %3752, %v397_v28  }
  0x47   : > { %605 = vperm.xlu1 %3753, %v398_v31  }
  0x48   : > { %610 = vperm.xlu0 %3752, %v399_v33  }
  0x4b   : > { %615 = vperm.xlu1 %3753, %v400_v37  }
  0x4c   : > { %620 = vperm.xlu0 %3752, %v401_v38  }
  0x4f   : > { %625 = vperm.xlu1 %3753, %v402_v42  }
  0x50   : > { %630 = vperm.xlu0 %3752, %v403_v43  }
  0x53   : > { %635 = vperm.xlu1 %3753, %v404_v47  }
  0x54   : > { %640 = vperm.xlu0 %3752, %v405_v48  }
  0x57   : > { %645 = vperm.xlu1 %3753, %v406_v52  }
  0x58   : > { %650 = vperm.xlu0 %3752, %v407_v53  }
  0x5b   : > { %655 = vperm.xlu1 %3753, %v408_v57  }
  0x85   : > { %v477_v20 = vpop.permute.xlu1 %476 }
  0x86   : > { %v473_v21 = vpop.permute.xlu0 %472 }
  0x89   : > { %v479_v24 = vpop.permute.xlu1 %478 }
  0x8a   : > { %v475_v25 = vpop.permute.xlu0 %474  ;;  %v482_v32 = vsel %vm480_vm1, %v477_v20, %v479_v24 }
  0x8b   : > { %792 = vmatprep.subr.bf16.mxu0 %v475_v25  ;;  %v481_v27 = vsel %vm480_vm1, %v473_v21, %v475_v25 }
  0x8c   : > { %793 = vmatpush1.bf16.msra.mxu0 %v481_v27 }
  0x8d   : > { %794 = vmatprep.subr.bf16.mxu0 %v479_v24  ;;  %v490_v29 = vpop.permute.xlu1 %489 }
  0x8e   : > { %v488_v30 = vpop.permute.xlu0 %487 }
  0x8f   : > { %v496_v34 = vsel %vm495_vm2, %v488_v30, %v490_v29 }
  0x90   : > { %795 = vmatpush1.bf16.msra.mxu0 %v482_v32 }
  0x91   : > { %796 = vmatprep.subr.bf16.mxu0 %v490_v29  ;;  %v494_v35 = vpop.permute.xlu1 %493 }
  0x92   : > { %v492_v36 = vpop.permute.xlu0 %491 }
  0x93   : > { %v497_v39 = vsel %vm495_vm2, %v492_v36, %v494_v35 }
  0x94   : > { %797 = vmatpush1.bf16.msra.mxu0 %v496_v34 }
  0x95   : > { %798 = vmatprep.subr.bf16.mxu0 %v494_v35  ;;  %v505_v40 = vpop.permute.xlu1 %504 }
  0x96   : > { %v503_v41 = vpop.permute.xlu0 %502 }
  0x97   : > { %v511_v44 = vsel %vm510_vm3, %v503_v41, %v505_v40 }
  0x98   : > { %799 = vmatpush1.bf16.msra.mxu0 %v497_v39 }
  0x99   : > { %800 = vmatprep.subr.bf16.mxu0 %v505_v40  ;;  %v509_v45 = vpop.permute.xlu1 %508 }
  0x9a   : > { %v507_v46 = vpop.permute.xlu0 %506 }
  0x9b   : > { %v512_v49 = vsel %vm510_vm3, %v507_v46, %v509_v45 }
  0x9c   : > { %801 = vmatpush1.bf16.msra.mxu0 %v511_v44 }
  0x9d   : > { %802 = vmatprep.subr.bf16.mxu0 %v509_v45  ;;  %v520_v50 = vpop.permute.xlu1 %519 }
  0x9e   : > { %v518_v51 = vpop.permute.xlu0 %517 }
  0x9f   : > { %v526_v54 = vsel %vm525_vm4, %v518_v51, %v520_v50 }
  0xa0   : > { %803 = vmatpush1.bf16.msra.mxu0 %v512_v49 }
  0xa1   : > { %804 = vmatprep.subr.bf16.mxu0 %v520_v50  ;;  %v524_v55 = vpop.permute.xlu1 %523 }
  0xa2   : > { %v522_v56 = vpop.permute.xlu0 %521 }
  0xa3   : > { %v527_v58 = vsel %vm525_vm4, %v522_v56, %v524_v55 }
  0xa4   : > { %805 = vmatpush1.bf16.msra.mxu0 %v526_v54 }
  0xa5   : > { %806 = vmatprep.subr.bf16.mxu0 %v524_v55 }
  0xa8   : > { %807 = vmatpush1.bf16.msra.mxu0 %v527_v58 }
  0xab   : > { %821 = vmatmul.mubr.bf16.vlgmr.msra.gmra.mrb[0].mxu0 %v3754_v59 }
  0xac   : > { %3309 = vmatprep.mubr.msk.bf16.mxu0 %vm754_vm0, %v3757_v60 }
  0xb2   : > { %v561_v21 = vpop.permute.xlu1 %560 }
  0xb3   : > { %831 = vmatmul.mubr.bf16.gmra.mrb[4].mxu0 %v3759_v61  ;;  %v556_v19 = vpop.permute.xlu0 %555 }
  0xb4   : > { %3310 = vmatprep.mubr.msk.bf16.mxu0 %vm754_vm0, %v3760_v62 }
  0xb6   : > { %v566_v29 = vpop.permute.xlu1 %565 }
  0xb7   : > { %v571_v31 = vpop.permute.xlu0 %570 }
  0xba   : > { %v576_v43 = vpop.permute.xlu1 %575 }
  0xbb   : > { %841 = vmatmul.mubr.bf16.gmra.mrb[8].mxu0 %v3762_v63  ;;  %v581_v49 = vpop.permute.xlu0 %580 }
  0xbc   : > { %3311 = vmatprep.mubr.msk.bf16.mxu0 %vm754_vm0, %v3763_v0 }
  0xbe   : > { %v586_v59 = vpop.permute.xlu1 %585 }
  0xc3   : > { %851 = vmatmul.mubr.bf16.gmra.mrb[12].mxu0 %v3765_v1  ;;  %v591_v1 = vpop.permute.xlu0 %590 }
  0xc4   : > { %3312 = vmatprep.mubr.msk.bf16.mxu0 %vm754_vm0, %v3766_v2 }
  0xc7   : > { %v601_v18 = vpop.permute.xlu0 %600 }
  0xcb   : > { %861 = vmatmul.mubr.bf16.gmra.mrb[16].mxu0 %v3768_v3 }
  0xcc   : > { %3313 = vmatprep.mubr.msk.bf16.mxu0 %vm754_vm0, %v3769_v4 }
  0xd3   : > { %871 = vmatmul.mubr.bf16.gmra.mrb[20].mxu0 %v3771_v5 }
  0xd4   : > { %3314 = vmatprep.mubr.msk.bf16.mxu0 %vm754_vm0, %v3772_v6 }
  0xdb   : > { %881 = vmatmul.mubr.bf16.gmra.mrb[24].mxu0 %v3774_v7 }
  0xdc   : > { %3315 = vmatprep.mubr.msk.bf16.mxu0 %vm754_vm0, %v3775_v8 }
  0xe3   : > { %891 = vmatmul.mubr.bf16.gmra.mrb[28].mxu0 %v3777_v9 }
  0xe4   : > { %3316 = vmatprep.mubr.msk.bf16.mxu0 %vm754_vm0, %v3778_v10 }
  0xeb   : > { %901 = vmatmul.mubr.bf16.gmra.mrb[32].mxu0 %v3780_v11  ;;  %v596_v11 = vpop.permute.xlu1 %595 }
  0xec   : > { %3317 = vmatprep.mubr.msk.bf16.mxu0 %vm754_vm0, %v3781_v12 }
  0xf3   : > { %911 = vmatmul.mubr.bf16.gmra.mrb[36].mxu0 %v3783_v14 }
  0xf4   : > { %3318 = vmatprep.mubr.msk.bf16.mxu0 %vm754_vm0, %v3307_v16 }
  0xfb   : > { %921 = vmatmul.mubr.bf16.gmra.mrb[40].mxu0 %v3306_v17 }
 0x17e   : > { %v822_v20 = vpop.f32.mrb[0].mxu0 }
 0x17f   : > { %v823_v22 = vadd.f32 %v822_v20, %v556_v19  ;;  %v824_v23 = vpop.f32.mrb[1].mxu0 }
 0x180   : > { %v825_v24 = vadd.f32 %v824_v23, %v556_v19  ;;  %v826_v25 = vpop.f32.mrb[2].mxu0 }
 0x181   : > { %3951 = vtanh.f32 %v823_v22  ;;  %v827_v26 = vadd.f32 %v826_v25, %v561_v21  ;;  %v828_v27 = vpop.f32.mrb[3].mxu0 }
 0x182   : > { %3953 = vtanh.f32 %v825_v24  ;;  %v829_v28 = vadd.f32 %v828_v27, %v561_v21 }
 0x183   : > { %3955 = vtanh.f32 %v827_v26 }
 0x184   : > { %3957 = vtanh.f32 %v829_v28  ;;  %v606_v28 = vpop.permute.xlu1 %605 }
 0x186   : > { %v832_v30 = vpop.f32.mrb[4].mxu0 }
 0x187   : > { %v833_v32 = vadd.f32 %v832_v30, %v566_v29  ;;  %v834_v33 = vpop.f32.mrb[5].mxu0 }
 0x188   : > { %v835_v34 = vadd.f32 %v834_v33, %v566_v29  ;;  %v836_v35 = vpop.f32.mrb[6].mxu0 }
 0x189   : > { %3959 = vtanh.f32 %v833_v32  ;;  %v837_v36 = vadd.f32 %v836_v35, %v571_v31  ;;  %v838_v37 = vpop.f32.mrb[7].mxu0 }
 0x18a   : > { %3961 = vtanh.f32 %v835_v34  ;;  %v839_v38 = vadd.f32 %v838_v37, %v571_v31  ;;  %v611_v34 = vpop.permute.xlu0 %610 }
 0x18b   : > { %v3952_v39 = vpop.eup %3951  ;;  %3963 = vtanh.f32 %v837_v36 }
 0x18c   : > { %v3954_v40 = vpop.eup %3953  ;;  %3965 = vtanh.f32 %v839_v38 }
 0x18d   : > { %v3956_v41 = vpop.eup %3955 }
 0x18e   : > { %v3958_v42 = vpop.eup %3957  ;;  %v842_v44 = vpop.f32.mrb[8].mxu0  ;;  %v983_v45 = vpack.c.bf16 %v3956_v41, %v3952_v39 }
 0x18f   : > { %v843_v46 = vadd.f32 %v842_v44, %v576_v43  ;;  %v844_v47 = vpop.f32.mrb[9].mxu0  ;;  %v984_v48 = vpack.c.bf16 %v3958_v42, %v3954_v40  ;;  %v616_v44 = vpop.permute.xlu1 %615 }
 0x190   : > { %v845_v50 = vadd.f32 %v844_v47, %v576_v43  ;;  %v846_v51 = vpop.f32.mrb[10].mxu0 }
 0x191   : > { %3967 = vtanh.f32 %v843_v46  ;;  %v847_v52 = vadd.f32 %v846_v51, %v581_v49  ;;  %v848_v53 = vpop.f32.mrb[11].mxu0  ;;  %1085 = vmatprep.subr.bf16.mxu1 %v984_v48 }
 0x192   : > { %3969 = vtanh.f32 %v845_v50  ;;  %v849_v54 = vadd.f32 %v848_v53, %v581_v49  ;;  %1086 = vmatpush1.bf16.msra.mxu1 %v983_v45  ;;  %v621_v50 = vpop.permute.xlu0 %620 }
 0x193   : > { %v3960_v55 = vpop.eup %3959  ;;  %3971 = vtanh.f32 %v847_v52 }
 0x194   : > { %v3962_v56 = vpop.eup %3961  ;;  %3973 = vtanh.f32 %v849_v54 }
 0x195   : > { %v3964_v57 = vpop.eup %3963 }
 0x196   : > { %v3966_v58 = vpop.eup %3965  ;;  %v852_v60 = vpop.f32.mrb[12].mxu0  ;;  %v985_v61 = vpack.c.bf16 %v3964_v57, %v3960_v55 }
 0x197   : > { %v853_v62 = vadd.f32 %v852_v60, %v586_v59  ;;  %v854_v63 = vpop.f32.mrb[13].mxu0  ;;  %v986_v0 = vpack.c.bf16 %v3966_v58, %v3962_v56  ;;  %v626_v60 = vpop.permute.xlu1 %625 }
 0x198   : > { %v855_v2 = vadd.f32 %v854_v63, %v586_v59  ;;  %v856_v3 = vpop.f32.mrb[14].mxu0 }
 0x199   : > { %3975 = vtanh.f32 %v853_v62  ;;  %v857_v4 = vadd.f32 %v856_v3, %v591_v1  ;;  %v858_v5 = vpop.f32.mrb[15].mxu0  ;;  %1087 = vmatprep.subr.bf16.mxu1 %v986_v0 }
 0x19a   : > { %3977 = vtanh.f32 %v855_v2  ;;  %v859_v6 = vadd.f32 %v858_v5, %v591_v1  ;;  %1088 = vmatpush1.bf16.msra.mxu1 %v985_v61  ;;  %v631_v2 = vpop.permute.xlu0 %630 }
 0x19b   : > { %v3968_v7 = vpop.eup %3967  ;;  %3979 = vtanh.f32 %v857_v4 }
 0x19c   : > { %v3970_v8 = vpop.eup %3969  ;;  %3981 = vtanh.f32 %v859_v6 }
 0x19d   : > { %v3972_v9 = vpop.eup %3971 }
 0x19e   : > { %v3974_v10 = vpop.eup %3973  ;;  %v862_v12 = vpop.f32.mrb[16].mxu0  ;;  %v987_v13 = vpack.c.bf16 %v3972_v9, %v3968_v7 }
 0x19f   : > { %v863_v14 = vadd.f32 %v862_v12, %v596_v11  ;;  %v864_v16 = vpop.f32.mrb[17].mxu0  ;;  %v988_v17 = vpack.c.bf16 %v3974_v10, %v3970_v8  ;;  %v636_v12 = vpop.permute.xlu1 %635 }
 0x1a0   : > { %v865_v19 = vadd.f32 %v864_v16, %v596_v11  ;;  %v866_v20 = vpop.f32.mrb[18].mxu0 }
 0x1a1   : > { %3983 = vtanh.f32 %v863_v14  ;;  %v867_v21 = vadd.f32 %v866_v20, %v601_v18  ;;  %v868_v22 = vpop.f32.mrb[19].mxu0  ;;  %1089 = vmatprep.subr.bf16.mxu1 %v988_v17 }
 0x1a2   : > { %3985 = vtanh.f32 %v865_v19  ;;  %v869_v23 = vadd.f32 %v868_v22, %v601_v18  ;;  %1090 = vmatpush1.bf16.msra.mxu1 %v987_v13  ;;  %v641_v19 = vpop.permute.xlu0 %640 }
 0x1a3   : > { %v3976_v24 = vpop.eup %3975  ;;  %3987 = vtanh.f32 %v867_v21 }
 0x1a4   : > { %v3978_v25 = vpop.eup %3977  ;;  %3989 = vtanh.f32 %v869_v23 }
 0x1a5   : > { %v3980_v26 = vpop.eup %3979 }
 0x1a6   : > { %v3982_v27 = vpop.eup %3981  ;;  %v872_v29 = vpop.f32.mrb[20].mxu0  ;;  %v989_v30 = vpack.c.bf16 %v3980_v26, %v3976_v24 }
 0x1a7   : > { %v873_v31 = vadd.f32 %v872_v29, %v606_v28  ;;  %v874_v32 = vpop.f32.mrb[21].mxu0  ;;  %v990_v33 = vpack.c.bf16 %v3982_v27, %v3978_v25  ;;  %v646_v29 = vpop.permute.xlu1 %645 }
 0x1a8   : > { %v875_v35 = vadd.f32 %v874_v32, %v606_v28  ;;  %v876_v36 = vpop.f32.mrb[22].mxu0 }
 0x1a9   : > { %3991 = vtanh.f32 %v873_v31  ;;  %v877_v37 = vadd.f32 %v876_v36, %v611_v34  ;;  %v878_v38 = vpop.f32.mrb[23].mxu0  ;;  %1091 = vmatprep.subr.bf16.mxu1 %v990_v33 }
 0x1aa   : > { %3993 = vtanh.f32 %v875_v35  ;;  %v879_v39 = vadd.f32 %v878_v38, %v611_v34  ;;  %1092 = vmatpush1.bf16.msra.mxu1 %v989_v30  ;;  %v651_v35 = vpop.permute.xlu0 %650 }
 0x1ab   : > { %v3984_v40 = vpop.eup %3983  ;;  %3995 = vtanh.f32 %v877_v37 }
 0x1ac   : > { %v3986_v41 = vpop.eup %3985  ;;  %3997 = vtanh.f32 %v879_v39 }
 0x1ad   : > { %v3988_v42 = vpop.eup %3987 }
 0x1ae   : > { %v3990_v43 = vpop.eup %3989  ;;  %v882_v45 = vpop.f32.mrb[24].mxu0  ;;  %v991_v46 = vpack.c.bf16 %v3988_v42, %v3984_v40 }
 0x1af   : > { %v883_v47 = vadd.f32 %v882_v45, %v616_v44  ;;  %v884_v48 = vpop.f32.mrb[25].mxu0  ;;  %v992_v49 = vpack.c.bf16 %v3990_v43, %v3986_v41  ;;  %v656_v45 = vpop.permute.xlu1 %655 }
 0x1b0   : > { %v885_v51 = vadd.f32 %v884_v48, %v616_v44  ;;  %v886_v52 = vpop.f32.mrb[26].mxu0 }
 0x1b1   : > { %3999 = vtanh.f32 %v883_v47  ;;  %v887_v53 = vadd.f32 %v886_v52, %v621_v50  ;;  %v888_v54 = vpop.f32.mrb[27].mxu0  ;;  %1093 = vmatprep.subr.bf16.mxu1 %v992_v49 }
 0x1b2   : > { %4001 = vtanh.f32 %v885_v51  ;;  %v889_v55 = vadd.f32 %v888_v54, %v621_v50  ;;  %1094 = vmatpush1.bf16.msra.mxu1 %v991_v46 }
 0x1b3   : > { %v3992_v56 = vpop.eup %3991  ;;  %4003 = vtanh.f32 %v887_v53 }
 0x1b4   : > { %v3994_v57 = vpop.eup %3993  ;;  %4005 = vtanh.f32 %v889_v55 }
 0x1b5   : > { %v3996_v58 = vpop.eup %3995 }
 0x1b6   : > { %v3998_v59 = vpop.eup %3997  ;;  %v892_v61 = vpop.f32.mrb[28].mxu0  ;;  %v993_v62 = vpack.c.bf16 %v3996_v58, %v3992_v56 }
 0x1b7   : > { %v893_v63 = vadd.f32 %v892_v61, %v626_v60  ;;  %v894_v0 = vpop.f32.mrb[29].mxu0  ;;  %v994_v1 = vpack.c.bf16 %v3998_v59, %v3994_v57 }
 0x1b8   : > { %v895_v3 = vadd.f32 %v894_v0, %v626_v60  ;;  %v896_v4 = vpop.f32.mrb[30].mxu0 }
 0x1b9   : > { %4007 = vtanh.f32 %v893_v63  ;;  %v897_v5 = vadd.f32 %v896_v4, %v631_v2  ;;  %v898_v6 = vpop.f32.mrb[31].mxu0  ;;  %1095 = vmatprep.subr.bf16.mxu1 %v994_v1  ;;  %v3786_v1 = vld [vmem:[%s5124_s3] ss:$8 sps:$4 sm:$0xff]  }
 0x1ba   : > { %4009 = vtanh.f32 %v895_v3  ;;  %v899_v7 = vadd.f32 %v898_v6, %v631_v2  ;;  %1096 = vmatpush1.bf16.msra.mxu1 %v993_v62  ;;  %v3789_v2 = vld [vmem:[%s5124_s3 + $0x14] ss:$8 sps:$4 sm:$0xff]   ;;  %v3804_v3 = vld [vmem:[%s5125_s4] sm:$0xff]   ;;  %v3805_v4 = vld [vmem:[%s5125_s4 + $0x8] sm:$0xff]  }
 0x1bb   : > { %v4000_v8 = vpop.eup %3999  ;;  %4011 = vtanh.f32 %v897_v5  ;;  %v3791_v5 = vld [vmem:[%s5124_s3 + $0x10] ss:$8 sps:$4 sm:$0xff]   ;;  %v3792_v6 = vld [vmem:[%s5124_s3 + $0x24] ss:$8 sps:$4 sm:$0xff]  }
 0x1bc   : > { %v4002_v9 = vpop.eup %4001  ;;  %4013 = vtanh.f32 %v899_v7  ;;  %v3806_v7 = vld [vmem:[%s5125_s4 + $0x10] sm:$0xff]  }
 0x1bd   : > { %v4004_v10 = vpop.eup %4003 }
 0x1be   : > { %v4006_v11 = vpop.eup %4005  ;;  %v902_v13 = vpop.f32.mrb[32].mxu0  ;;  %v995_v14 = vpack.c.bf16 %v4004_v10, %v4000_v8  ;;  %v3807_v8 = vld [vmem:[%s5125_s4 + $0x18] sm:$0xff]  }
 0x1bf   : > { %v903_v16 = vadd.f32 %v902_v13, %v636_v12  ;;  %v904_v17 = vpop.f32.mrb[33].mxu0  ;;  %v996_v18 = vpack.c.bf16 %v4006_v11, %v4002_v9  ;;  %v3794_v9 = vld [vmem:[%s5124_s3 + $0x20] ss:$8 sps:$4 sm:$0xff]   ;;  %v3795_v10 = vld [vmem:[%s5124_s3 + $0x34] ss:$8 sps:$4 sm:$0xff]  }
 0x1c0   : > { %v905_v20 = vadd.f32 %v904_v17, %v636_v12  ;;  %v906_v21 = vpop.f32.mrb[34].mxu0  ;;  %v3808_v11 = vld [vmem:[%s5125_s4 + $0x20] sm:$0xff]   ;;  %v3809_v12 = vld [vmem:[%s5125_s4 + $0x28] sm:$0xff]   ;;  %v3797_v13 = vld [vmem:[%s5124_s3 + $0x30] ss:$8 sps:$4 sm:$0xff]  }
 0x1c1   : > { %4015 = vtanh.f32 %v903_v16  ;;  %v907_v22 = vadd.f32 %v906_v21, %v641_v19  ;;  %v908_v23 = vpop.f32.mrb[35].mxu0  ;;  %1097 = vmatprep.subr.bf16.mxu1 %v996_v18  ;;  %v3810_v16 = vld [vmem:[%s5125_s4 + $0x30] sm:$0xff]   ;;  %v3811_v17 = vld [vmem:[%s5125_s4 + $0x38] sm:$0xff]   ;;  %v3800_v18 = vld [vmem:[%s5124_s3 + $0x40] ss:$8 sps:$4 sm:$0xff]  }
 0x1c2   : > { %4017 = vtanh.f32 %v905_v20  ;;  %v909_v24 = vadd.f32 %v908_v23, %v641_v19  ;;  %1098 = vmatpush1.bf16.msra.mxu1 %v995_v14  ;;  %v3798_v14 = vld [vmem:[%s5124_s3 + $0x44] ss:$8 sps:$4 sm:$0xff]   ;;  %v3801_v19 = vld [vmem:[%s5124_s3 + $0x54] ss:$8 sps:$4 sm:$0xff]  }
 0x1c3   : > { %v4008_v25 = vpop.eup %4007  ;;  %4019 = vtanh.f32 %v907_v22  ;;  %v3812_v20 = vld [vmem:[%s5125_s4 + $0x40] sm:$0xff]   ;;  %v3813_v21 = vld [vmem:[%s5125_s4 + $0x48] sm:$0xff]   ;;  %v3803_v22 = vld [vmem:[%s5124_s3 + $0x50] ss:$8 sps:$4 sm:$0xff]  }
 0x1c4   : > { %v4010_v26 = vpop.eup %4009  ;;  %4021 = vtanh.f32 %v909_v24  ;;  %v3814_v23 = vld [vmem:[%s5125_s4 + $0x50] sm:$0xff]   ;;  %v3815_v24 = vld [vmem:[%s5125_s4 + $0x58] sm:$0xff]  }
 0x1c5   : > { %v4012_v27 = vpop.eup %4011 }
 0x1c6   : > { %v4014_v28 = vpop.eup %4013  ;;  %v912_v30 = vpop.f32.mrb[36].mxu0  ;;  %v997_v31 = vpack.c.bf16 %v4012_v27, %v4008_v25  ;;  %v3816_v25 = vld [vmem:[%s5125_s4 + $0x60] sm:$0xff]  }
 0x1c7   : > { %v913_v32 = vadd.f32 %v912_v30, %v646_v29  ;;  %v914_v33 = vpop.f32.mrb[37].mxu0  ;;  %v998_v34 = vpack.c.bf16 %v4014_v28, %v4010_v26  ;;  %v3817_v26 = vld [vmem:[%s5125_s4 + $0x68] sm:$0xff]  }
 0x1c8   : > { %v915_v36 = vadd.f32 %v914_v33, %v646_v29  ;;  %v916_v37 = vpop.f32.mrb[38].mxu0 }
 0x1c9   : > { %4023 = vtanh.f32 %v913_v32  ;;  %v917_v38 = vadd.f32 %v916_v37, %v651_v35  ;;  %v918_v39 = vpop.f32.mrb[39].mxu0  ;;  %1099 = vmatprep.subr.bf16.mxu1 %v998_v34 }
 0x1ca   : > { %4025 = vtanh.f32 %v915_v36  ;;  %v919_v40 = vadd.f32 %v918_v39, %v651_v35  ;;  %1100 = vmatpush1.bf16.msra.mxu1 %v997_v31 }
 0x1cb   : > { %v4016_v41 = vpop.eup %4015  ;;  %4027 = vtanh.f32 %v917_v38 }
 0x1cc   : > { %v4018_v42 = vpop.eup %4017  ;;  %4029 = vtanh.f32 %v919_v40 }
 0x1cd   : > { %v4020_v43 = vpop.eup %4019 }
 0x1ce   : > { %v4022_v44 = vpop.eup %4021  ;;  %v922_v46 = vpop.f32.mrb[40].mxu0  ;;  %v999_v47 = vpack.c.bf16 %v4020_v43, %v4016_v41 }
 0x1cf   : > { %v923_v48 = vadd.f32 %v922_v46, %v656_v45  ;;  %v924_v49 = vpop.f32.mrb[41].mxu0  ;;  %v1000_v50 = vpack.c.bf16 %v4022_v44, %v4018_v42 }
 0x1d0   : > { %v925_v51 = vadd.f32 %v924_v49, %v656_v45  ;;  %v926_v52 = vpop.f32.mrb[42].mxu0 }
 0x1d1   : > { %4031 = vtanh.f32 %v923_v48  ;;  %v927_v53 = vpop.f32.mrb[43].mxu0  ;;  %1101 = vmatprep.subr.bf16.mxu1 %v1000_v50 }
 0x1d2   : > { %4033 = vtanh.f32 %v925_v51  ;;  %1102 = vmatpush1.bf16.msra.mxu1 %v999_v47 }
 0x1d3   : > { %v4024_v54 = vpop.eup %4023 }
 0x1d4   : > { %v4026_v55 = vpop.eup %4025 }
 0x1d5   : > { %v4028_v56 = vpop.eup %4027 }
 0x1d6   : > { %v4030_v57 = vpop.eup %4029  ;;  %v1001_v58 = vpack.c.bf16 %v4028_v56, %v4024_v54 }
 0x1d7   : > { %v1002_v59 = vpack.c.bf16 %v4030_v57, %v4026_v55 }
 0x1d9   : > { %1103 = vmatprep.subr.bf16.mxu1 %v1002_v59 }
 0x1da   : > { %1104 = vmatpush1.bf16.msra.mxu1 %v1001_v58 }
 0x1db   : > { %v4032_v60 = vpop.eup %4031 }
 0x1dc   : > { %v4034_v61 = vpop.eup %4033  ;;  %v1003_v62 = vpack.c.bf16 %v4032_v60, %v4032_v60 }
 0x1dd   : > { %v1004_v63 = vpack.c.bf16 %v4034_v61, %v4034_v61 }
 0x1de   : > { %v1080_v0 = vsel %vm1078_vm6, %v1003_v62, 0 }
 0x1df   : > { %3331 = vmatprep.subr.msk.bf16.mxu1 %vm1078_vm6, %v1004_v63 }
 0x1e0   : > { %1106 = vmatpush1.bf16.msra.mxu1 %v1080_v0 }
 0x1e1   : > { %1321 = vmatprep.subr.bf16.mxu1 %v4139_v15 }
 0x1e3   : > { %1118 = vmatmul.mubr.bf16.vlgmr.msra.gmra.mrb[0].mxu1 %v3786_v1 }
 0x1e4   : > { %3333 = vmatprep.mubr.msk.bf16.mxu1 %vm1059_vm5, %v3789_v2  ;;  %1322 = vmatpush1.bf16.msra.mxu1 %v3804_v3 }
 0x1e5   : > { %1323 = vmatprep.subr.bf16.mxu1 %v4139_v15 }
 0x1e8   : > { %1324 = vmatpush1.bf16.msra.mxu1 %v3805_v4 }
 0x1e9   : > { %1325 = vmatprep.subr.bf16.mxu1 %v4139_v15 }
 0x1eb   : > { %1128 = vmatmul.mubr.bf16.gmra.mrb[4].mxu1 %v3791_v5 }
 0x1ec   : > { %3334 = vmatprep.mubr.msk.bf16.mxu1 %vm1059_vm5, %v3792_v6  ;;  %1326 = vmatpush1.bf16.msra.mxu1 %v3806_v7 }
 0x1ed   : > { %1327 = vmatprep.subr.bf16.mxu1 %v4139_v15 }
 0x1f0   : > { %1328 = vmatpush1.bf16.msra.mxu1 %v3807_v8 }
 0x1f1   : > { %1329 = vmatprep.subr.bf16.mxu1 %v4139_v15 }
 0x1f3   : > { %1138 = vmatmul.mubr.bf16.gmra.mrb[8].mxu1 %v3794_v9 }
 0x1f4   : > { %3335 = vmatprep.mubr.msk.bf16.mxu1 %vm1059_vm5, %v3795_v10  ;;  %1330 = vmatpush1.bf16.msra.mxu1 %v3808_v11 }
 0x1f5   : > { %1331 = vmatprep.subr.bf16.mxu1 %v4139_v15 }
 0x1f8   : > { %1332 = vmatpush1.bf16.msra.mxu1 %v3809_v12 }
 0x1f9   : > { %1333 = vmatprep.subr.bf16.mxu1 %v4139_v15 }
 0x1fb   : > { %1148 = vmatmul.mubr.bf16.gmra.mrb[12].mxu1 %v3797_v13 }
 0x1fc   : > { %3336 = vmatprep.mubr.msk.bf16.mxu1 %vm1059_vm5, %v3798_v14  ;;  %1334 = vmatpush1.bf16.msra.mxu1 %v3810_v16 }
 0x1fd   : > { %1335 = vmatprep.subr.bf16.mxu1 %v4139_v15 }
 0x200   : > { %1336 = vmatpush1.bf16.msra.mxu1 %v3811_v17 }
 0x201   : > { %1337 = vmatprep.subr.bf16.mxu1 %v4139_v15 }
 0x203   : > { %1158 = vmatmul.mubr.bf16.gmra.mrb[16].mxu1 %v3800_v18 }
 0x204   : > { %3337 = vmatprep.mubr.msk.bf16.mxu1 %vm1059_vm5, %v3801_v19  ;;  %1338 = vmatpush1.bf16.msra.mxu1 %v3812_v20 }
 0x205   : > { %1339 = vmatprep.subr.bf16.mxu1 %v4139_v15 }
 0x208   : > { %1340 = vmatpush1.bf16.msra.mxu1 %v3813_v21 }
 0x209   : > { %1341 = vmatprep.subr.bf16.mxu1 %v4139_v15 }
 0x20b   : > { %1168 = vmatmul.mubr.bf16.gmra.mrb[20].mxu1 %v3803_v22 }
 0x20c   : > { %1342 = vmatpush1.bf16.msra.mxu1 %v3814_v23 }
 0x20d   : > { %1343 = vmatprep.subr.bf16.mxu1 %v4139_v15 }
 0x210   : > { %1344 = vmatpush1.bf16.msra.mxu1 %v3815_v24 }
 0x211   : > { %1345 = vmatprep.subr.bf16.mxu1 %v4139_v15 }
 0x214   : > { %1346 = vmatpush1.bf16.msra.mxu1 %v3816_v25 }
 0x215   : > { %1347 = vmatprep.subr.bf16.mxu1 %v4139_v15 }
 0x218   : > { %1348 = vmatpush1.bf16.msra.mxu1 %v3817_v26 }
 0x219   : > { %1959 = vmatprep.subr.bf16.mxu1 %v4139_v15 }
 0x2b6   : > { %v1119_v27 = vpop.f32.mrb[0].mxu1 }
 0x2b7   : > { %v1121_v28 = vpop.f32.mrb[1].mxu1 }
 0x2b8   : > { %v1123_v29 = vpop.f32.mrb[2].mxu1 }
 0x2b9   : > { %v1178_v30 = vpack.c.bf16 %v1123_v29, %v1119_v27  ;;  %v1125_v31 = vpop.f32.mrb[3].mxu1 }
 0x2ba   : > { %v1179_v32 = vpack.c.bf16 %v1125_v31, %v1121_v28  ;;  %v3825_v31 = vld [vmem:[%s5123_s2 + $0xc] ss:$16 sps:$4 sm:$0xff]  }
 0x2bc   : > { %3352 = vmatprep.mubr.msk.bf16.mxu1 %vm525_vm4, %v1179_v32  ;;  %v409_v32 = vld [vmem:[%s5131_s10 + $0xa8] sm:$0xff] }
 0x2bd   : > { %1354 = vmatmul.mubr.bf16.vlgmr.msra.gmra.mrb[24].mxu1 %v1178_v30  ;;  %v3820_v30 = vld [vmem:[%s5123_s2 + $0x4] ss:$16 sps:$4 sm:$0xff]  }
 0x2be   : > { %v1129_v33 = vpop.f32.mrb[4].mxu1  ;;  %1878 = vmatprep.mubr.bf16.mxu0 %v3820_v30  ;;  %v3847_v30 = vld [vmem:[%s5123_s2 + $0x8c] ss:$16 sps:$4 sm:$0xff]  }
 0x2bf   : > { %v1131_v34 = vpop.f32.mrb[5].mxu1 }
 0x2c0   : > { %v1133_v35 = vpop.f32.mrb[6].mxu1 }
 0x2c1   : > { %v1180_v36 = vpack.c.bf16 %v1133_v35, %v1129_v33  ;;  %v1135_v37 = vpop.f32.mrb[7].mxu1  ;;  %v411_v33 = vld [vmem:[%s5131_s10 + $0xb8] sm:$0xff]  ;;  %v410_v35 = vld [vmem:[%s5131_s10 + $0xb0] sm:$0xff] }
 0x2c2   : > { %v1181_v38 = vpack.c.bf16 %v1135_v37, %v1131_v34  ;;  %v413_v34 = vld [vmem:[%s5131_s10 + $0xc8] sm:$0xff]  ;;  %v412_v37 = vld [vmem:[%s5131_s10 + $0xc0] sm:$0xff] }
 0x2c4   : > { %3353 = vmatprep.mubr.msk.bf16.mxu1 %vm525_vm4, %v1181_v38  ;;  %v417_v38 = vld [vmem:[%s5131_s10 + $0xe8] sm:$0xff] }
 0x2c5   : > { %1362 = vmatmul.mubr.bf16.gmra.mrb[28].mxu1 %v1180_v36  ;;  %v415_v36 = vld [vmem:[%s5131_s10 + $0xd8] sm:$0xff] }
 0x2c6   : > { %v1139_v39 = vpop.f32.mrb[8].mxu1 }
 0x2c7   : > { %v1141_v40 = vpop.f32.mrb[9].mxu1 }
 0x2c8   : > { %v1143_v41 = vpop.f32.mrb[10].mxu1 }
 0x2c9   : > { %v1182_v42 = vpack.c.bf16 %v1143_v41, %v1139_v39  ;;  %v1145_v43 = vpop.f32.mrb[11].mxu1  ;;  %v414_v39 = vld [vmem:[%s5131_s10 + $0xd0] sm:$0xff]  ;;  %v416_v41 = vld [vmem:[%s5131_s10 + $0xe0] sm:$0xff] }
 0x2ca   : > { %v1183_v44 = vpack.c.bf16 %v1145_v43, %v1141_v40  ;;  %v419_v40 = vld [vmem:[%s5131_s10 + $0xf8] sm:$0xff]  ;;  %v418_v43 = vld [vmem:[%s5131_s10 + $0xf0] sm:$0xff] }
 0x2cc   : > { %3354 = vmatprep.mubr.msk.bf16.mxu1 %vm525_vm4, %v1183_v44  ;;  %v423_v44 = vld [vmem:[%s5131_s10 + $0x118] sm:$0xff] }
 0x2cd   : > { %1370 = vmatmul.mubr.bf16.gmra.mrb[32].mxu1 %v1182_v42  ;;  %v421_v42 = vld [vmem:[%s5131_s10 + $0x108] sm:$0xff] }
 0x2ce   : > { %v1149_v45 = vpop.f32.mrb[12].mxu1 }
 0x2cf   : > { %v1151_v46 = vpop.f32.mrb[13].mxu1 }
 0x2d0   : > { %v1153_v47 = vpop.f32.mrb[14].mxu1 }
 0x2d1   : > { %v1184_v48 = vpack.c.bf16 %v1153_v47, %v1149_v45  ;;  %v1155_v49 = vpop.f32.mrb[15].mxu1  ;;  %v420_v45 = vld [vmem:[%s5131_s10 + $0x100] sm:$0xff]  ;;  %v422_v47 = vld [vmem:[%s5131_s10 + $0x110] sm:$0xff] }
 0x2d2   : > { %v1185_v50 = vpack.c.bf16 %v1155_v49, %v1151_v46  ;;  %v425_v46 = vld [vmem:[%s5131_s10 + $0x128] sm:$0xff]  ;;  %v424_v49 = vld [vmem:[%s5131_s10 + $0x120] sm:$0xff] }
 0x2d4   : > { %3355 = vmatprep.mubr.msk.bf16.mxu1 %vm525_vm4, %v1185_v50  ;;  %v426_v50 = vld [vmem:[%s5131_s10 + $0x130] sm:$0xff] }
 0x2d5   : > { %1378 = vmatmul.mubr.bf16.gmra.mrb[36].mxu1 %v1184_v48  ;;  %v427_v48 = vld [vmem:[%s5131_s10 + $0x138] sm:$0xff] }
 0x2d6   : > { %v1159_v51 = vpop.f32.mrb[16].mxu1 }
 0x2d7   : > { %v1161_v52 = vpop.f32.mrb[17].mxu1 }
 0x2d8   : > { %v1163_v53 = vpop.f32.mrb[18].mxu1 }
 0x2d9   : > { %v1186_v54 = vpack.c.bf16 %v1163_v53, %v1159_v51  ;;  %v1165_v55 = vpop.f32.mrb[19].mxu1  ;;  %v428_v51 = vld [vmem:[%s5131_s10 + $0x140] sm:$0xff] }
 0x2da   : > { %v1187_v56 = vpack.c.bf16 %v1165_v55, %v1161_v52 }
 0x2dc   : > { %3356 = vmatprep.mubr.msk.bf16.mxu1 %vm525_vm4, %v1187_v56 }
 0x2dd   : > { %1386 = vmatmul.mubr.bf16.gmra.mrb[40].mxu1 %v1186_v54 }
 0x2de   : > { %v1169_v57 = vpop.f32.mrb[20].mxu1 }
 0x2df   : > { %v1171_v58 = vpop.f32.mrb[21].mxu1 }
 0x2e0   : > { %v1173_v59 = vpop.f32.mrb[22].mxu1 }
 0x2e1   : > { %v1188_v60 = vpack.c.bf16 %v1173_v59, %v1169_v57  ;;  %v1175_v61 = vpop.f32.mrb[23].mxu1 }
 0x2e2   : > { %v1189_v62 = vpack.c.bf16 %v1175_v61, %v1171_v58 }
 0x2e4   : > { %3357 = vmatprep.mubr.msk.bf16.mxu1 %vm525_vm4, %v1189_v62 }
 0x2e5   : > { %1394 = vmatmul.mubr.bf16.gmra.mrb[44].mxu1 %v1188_v60 }
 0x2e6   : > { %3398 = vmatprep.mubr.msk.bf16.mxu1 %vm525_vm4, %v3825_v31  ;;  %v3849_v31 = vld [vmem:[%s5123_s2 + $0xa0] ss:$16 sps:$4 sm:$0xff]  }
 0x390   : > { %v1355_v63 = vpop.f32.mrb[24].mxu1 }
 0x391   : > { %v1357_v0 = vpop.f32.mrb[25].mxu1 }
 0x392   : > { %v1358_v1 = vpop.f32.mrb[26].mxu1 }
 0x393   : > { %v4484_v2 = vpack.c.bf16 %v1358_v1, %v1355_v63  ;;  %v1360_v3 = vpop.f32.mrb[27].mxu1 }
 0x398   : > { %v1363_v4 = vpop.f32.mrb[28].mxu1 }
 0x399   : > { %v1365_v5 = vpop.f32.mrb[29].mxu1 }
 0x39a   : > { %v1366_v6 = vpop.f32.mrb[30].mxu1 }
 0x39b   : > { %v4486_v7 = vpack.c.bf16 %v1366_v6, %v1363_v4  ;;  %v1368_v8 = vpop.f32.mrb[31].mxu1 }
 0x3a0   : > { %v1371_v9 = vpop.f32.mrb[32].mxu1 }
 0x3a1   : > { %v1373_v10 = vpop.f32.mrb[33].mxu1 }
 0x3a2   : > { %v1374_v11 = vpop.f32.mrb[34].mxu1  ;;  %v3818_v10 = vld [vmem:[%s5123_s2] ss:$16 sps:$4 sm:$0xff]  }
 0x3a3   : > { %v4488_v12 = vpack.c.bf16 %v1374_v11, %v1371_v9  ;;  %v1376_v13 = vpop.f32.mrb[35].mxu1  ;;  %v3821_v11 = vld [vmem:[%s5123_s2 + $0x24] ss:$16 sps:$4 sm:$0xff]  }
 0x3a8   : > { %v1379_v14 = vpop.f32.mrb[36].mxu1 }
 0x3a9   : > { %v1381_v16 = vpop.f32.mrb[37].mxu1 }
 0x3aa   : > { %v1382_v17 = vpop.f32.mrb[38].mxu1  ;;  %v3826_v16 = vld [vmem:[%s5123_s2 + $0x20] ss:$16 sps:$4 sm:$0xff]  }
 0x3ab   : > { %v4490_v18 = vpack.c.bf16 %v1382_v17, %v1379_v14  ;;  %v1384_v19 = vpop.f32.mrb[39].mxu1  ;;  %v3823_v14 = vld [vmem:[%s5123_s2 + $0x8] ss:$16 sps:$4 sm:$0xff]   ;;  %v3827_v17 = vld [vmem:[%s5123_s2 + $0x44] ss:$16 sps:$4 sm:$0xff]  }
 0x3ac   : > { %v3831_v19 = vld [vmem:[%s5123_s2 + $0x40] ss:$16 sps:$4 sm:$0xff]  }
 0x3b0   : > { %v1387_v20 = vpop.f32.mrb[40].mxu1 }
 0x3b1   : > { %v1389_v21 = vpop.f32.mrb[41].mxu1 }
 0x3b2   : > { %v1390_v22 = vpop.f32.mrb[42].mxu1  ;;  %v3833_v21 = vld [vmem:[%s5123_s2 + $0x64] ss:$16 sps:$4 sm:$0xff]  }
 0x3b3   : > { %v4492_v23 = vpack.c.bf16 %v1390_v22, %v1387_v20  ;;  %v1392_v24 = vpop.f32.mrb[43].mxu1  ;;  %v3832_v20 = vld [vmem:[%s5123_s2 + $0x28] ss:$16 sps:$4 sm:$0xff]   ;;  %v3835_v22 = vld [vmem:[%s5123_s2 + $0x4c] ss:$16 sps:$4 sm:$0xff]  }
 0x3b4   : > { %v3838_v24 = vld [vmem:[%s5123_s2 + $0x48] ss:$16 sps:$4 sm:$0xff]  }
 0x3b5   : > { %1440 = vrot.lane.b32.xlu0 %v4492_v23, %s4136_s24 }
 0x3b8   : > { %v1395_v25 = vpop.f32.mrb[44].mxu1 }
 0x3b9   : > { %1450 = vrot.lane.b32.xlu0 %v4484_v2, %s4137_s25  ;;  %v1397_v26 = vpop.f32.mrb[45].mxu1 }
 0x3ba   : > { %v1398_v27 = vpop.f32.mrb[46].mxu1  ;;  %v3841_v26 = vld [vmem:[%s5123_s2 + $0x6c] ss:$16 sps:$4 sm:$0xff]  }
 0x3bb   : > { %v4498_v28 = vpack.c.bf16 %v1398_v27, %v1395_v25  ;;  %v1400_v29 = vpop.f32.mrb[47].mxu1  ;;  %v3839_v25 = vld [vmem:[%s5123_s2 + $0x84] ss:$16 sps:$4 sm:$0xff]   ;;  %v3843_v27 = vld [vmem:[%s5123_s2 + $0x80] ss:$16 sps:$4 sm:$0xff]  }
 0x3bc   : > { %v3845_v29 = vld [vmem:[%s5123_s2 + $0xa4] ss:$16 sps:$4 sm:$0xff]  }
 0x3bd   : > { %1454 = vrot.lane.b32.xlu0 %v4488_v12, %s4137_s25  ;;  %1442 = vrot.lane.b32.xlu1 %v4498_v28, %s4136_s24 }
 0x3c1   : > { %1456 = vrot.lane.b32.xlu0 %v4490_v18, %s4137_s25  ;;  %1452 = vrot.lane.b32.xlu1 %v4486_v7, %s4137_s25 }
 0x3c5   : > { %1458 = vrot.lane.b32.xlu0 %v4492_v23, %s4137_s25  ;;  %1418 = vrot.lane.b32.xlu1 %v4488_v12, %s4135_s23 }
 0x3c9   : > { %1468 = vrot.lane.b32.xlu0 %v4484_v2, %s4138_s28  ;;  %1420 = vrot.lane.b32.xlu1 %v4490_v18, %s4135_s23 }
 0x3cd   : > { %1460 = vrot.lane.b32.xlu0 %v4498_v28, %s4137_s25  ;;  %1422 = vrot.lane.b32.xlu1 %v4492_v23, %s4135_s23 }
 0x3d1   : > { %1470 = vrot.lane.b32.xlu0 %v4486_v7, %s4138_s28  ;;  %1424 = vrot.lane.b32.xlu1 %v4498_v28, %s4135_s23 }
 0x3d5   : > { %1472 = vrot.lane.b32.xlu0 %v4488_v12, %s4138_s28  ;;  %1432 = vrot.lane.b32.xlu1 %v4484_v2, %s4136_s24 }
 0x3d9   : > { %1414 = vrot.lane.b32.xlu0 %v4484_v2, %s4135_s23  ;;  %1434 = vrot.lane.b32.xlu1 %v4486_v7, %s4136_s24 }
 0x3dd   : > { %1438 = vrot.lane.b32.xlu0 %v4490_v18, %s4136_s24  ;;  %1436 = vrot.lane.b32.xlu1 %v4488_v12, %s4136_s24 }
 0x3e1   : > { %1476 = vrot.lane.b32.xlu0 %v4492_v23, %s4138_s28  ;;  %1474 = vrot.lane.b32.xlu1 %v4490_v18, %s4138_s28 }
 0x3e5   : > { %1528 = vperm.xlu0 %3752, %v409_v32   ;;  %1416 = vrot.lane.b32.xlu1 %v4486_v7, %s4135_s23  ;;  %v3850_v32 = vld [vmem:[%s5123_s2 + $0x88] ss:$16 sps:$4 sm:$0xff]  }
 0x3e9   : > { %1538 = vperm.xlu0 %3752, %v411_v33   ;;  %1478 = vrot.lane.b32.xlu1 %v4498_v28, %s4138_s28  ;;  %v3851_v33 = vld [vmem:[%s5123_s2 + $0xc4] ss:$16 sps:$4 sm:$0xff]  }
 0x3ed   : > { %1548 = vperm.xlu0 %3752, %v413_v34   ;;  %1533 = vperm.xlu1 %3753, %v410_v35   ;;  %v3853_v34 = vld [vmem:[%s5123_s2 + $0xac] ss:$16 sps:$4 sm:$0xff]   ;;  %v3855_v35 = vld [vmem:[%s5123_s2 + $0xc0] ss:$16 sps:$4 sm:$0xff]  }
 0x3f1   : > { %1558 = vperm.xlu0 %3752, %v415_v36   ;;  %1543 = vperm.xlu1 %3753, %v412_v37   ;;  %v3856_v36 = vld [vmem:[%s5123_s2 + $0xa8] ss:$16 sps:$4 sm:$0xff]   ;;  %v3857_v37 = vld [vmem:[%s5123_s2 + $0xe4] ss:$16 sps:$4 sm:$0xff]  }
 0x3f5   : > { %1568 = vperm.xlu0 %3752, %v417_v38   ;;  %1553 = vperm.xlu1 %3753, %v414_v39   ;;  %v3859_v38 = vld [vmem:[%s5123_s2 + $0xcc] ss:$16 sps:$4 sm:$0xff]   ;;  %v3861_v39 = vld [vmem:[%s5123_s2 + $0xe0] ss:$16 sps:$4 sm:$0xff]  }
 0x3f9   : > { %1578 = vperm.xlu0 %3752, %v419_v40   ;;  %1563 = vperm.xlu1 %3753, %v416_v41   ;;  %v3862_v40 = vld [vmem:[%s5123_s2 + $0xc8] ss:$16 sps:$4 sm:$0xff]   ;;  %v3863_v41 = vld [vmem:[%s5123_s2 + $0x104] ss:$16 sps:$4 sm:$0xff]  }
 0x3fd   : > { %1588 = vperm.xlu0 %3752, %v421_v42   ;;  %1573 = vperm.xlu1 %3753, %v418_v43   ;;  %v3865_v42 = vld [vmem:[%s5123_s2 + $0xec] ss:$16 sps:$4 sm:$0xff]   ;;  %v3867_v43 = vld [vmem:[%s5123_s2 + $0x100] ss:$16 sps:$4 sm:$0xff]  }
 0x401   : > { %1598 = vperm.xlu0 %3752, %v423_v44   ;;  %1583 = vperm.xlu1 %3753, %v420_v45   ;;  %v3868_v44 = vld [vmem:[%s5123_s2 + $0xe8] ss:$16 sps:$4 sm:$0xff]   ;;  %v3869_v45 = vld [vmem:[%s5123_s2 + $0x124] ss:$16 sps:$4 sm:$0xff]  }
 0x405   : > { %1608 = vperm.xlu0 %3752, %v425_v46   ;;  %1593 = vperm.xlu1 %3753, %v422_v47   ;;  %v3871_v46 = vld [vmem:[%s5123_s2 + $0x10c] ss:$16 sps:$4 sm:$0xff]   ;;  %v3873_v47 = vld [vmem:[%s5123_s2 + $0x120] ss:$16 sps:$4 sm:$0xff]  }
 0x409   : > { %1618 = vperm.xlu0 %3752, %v427_v48   ;;  %1603 = vperm.xlu1 %3753, %v424_v49   ;;  %v3874_v48 = vld [vmem:[%s5123_s2 + $0x108] ss:$16 sps:$4 sm:$0xff]   ;;  %v3875_v49 = vld [vmem:[%s5123_s2 + $0x12c] ss:$16 sps:$4 sm:$0xff]  }
 0x40d   : > { %1613 = vperm.xlu1 %3753, %v426_v50   ;;  %v3877_v50 = vld [vmem:[%s5123_s2 + $0x128] ss:$16 sps:$4 sm:$0xff]  }
 0x411   : > { %1623 = vperm.xlu1 %3753, %v428_v51   ;;  %v3880_v51 = vld [vmem:[%s5126_s5 + $0x4] ss:$8 sps:$4 sm:$0xff]  }
 0x427   : > { %v1441_v52 = vpop.permute.xlu0 %1440 }
 0x428   : > { %1960 = vmatpush1.bf16.msra.mxu1 %v1441_v52 }
 0x429   : > { %1961 = vmatprep.subr.bf16.mxu1 %v4139_v15 }
 0x42b   : > { %v1451_v53 = vpop.permute.xlu0 %1450 }
 0x42f   : > { %v1455_v54 = vpop.permute.xlu0 %1454  ;;  %v1443_v55 = vpop.permute.xlu1 %1442 }
 0x430   : > { %1962 = vmatpush1.bf16.msra.mxu1 %v1443_v55 }
 0x431   : > { %1963 = vmatprep.subr.bf16.mxu1 %v4139_v15 }
 0x433   : > { %v1457_v56 = vpop.permute.xlu0 %1456  ;;  %v1453_v57 = vpop.permute.xlu1 %1452 }
 0x434   : > { %1964 = vmatpush1.bf16.msra.mxu1 %v1451_v53 }
 0x435   : > { %1965 = vmatprep.subr.bf16.mxu1 %v4139_v15 }
 0x437   : > { %v1459_v58 = vpop.permute.xlu0 %1458  ;;  %v1419_v59 = vpop.permute.xlu1 %1418 }
 0x438   : > { %3491 = vmatprep.subr.bf16.mxu0 %v1419_v59  ;;  %1966 = vmatpush1.bf16.msra.mxu1 %v1453_v57 }
 0x439   : > { %3492 = vmatpush3.bf16.msra.mxu0 %v4484_v2  ;;  %1967 = vmatprep.subr.bf16.mxu1 %v4139_v15 }
 0x43b   : > { %v1469_v60 = vpop.permute.xlu0 %1468  ;;  %v1421_v61 = vpop.permute.xlu1 %1420 }
 0x43c   : > { %3493 = vmatprep.subr.bf16.mxu0 %v1421_v61  ;;  %1968 = vmatpush1.bf16.msra.mxu1 %v1455_v54 }
 0x43d   : > { %3494 = vmatpush3.bf16.msra.mxu0 %v4486_v7  ;;  %1969 = vmatprep.subr.bf16.mxu1 %v4139_v15 }
 0x43f   : > { %v1461_v62 = vpop.permute.xlu0 %1460  ;;  %v1423_v63 = vpop.permute.xlu1 %1422 }
 0x440   : > { %3495 = vmatprep.subr.bf16.mxu0 %v1423_v63  ;;  %1970 = vmatpush1.bf16.msra.mxu1 %v1457_v56  ;;  %v3894_v63 = vld [vmem:[%s5127_s6 + $0x8] sm:$0xff]  }
 0x441   : > { %3496 = vmatpush3.bf16.msra.mxu0 %v4488_v12  ;;  %1971 = vmatprep.subr.bf16.mxu1 %v4139_v15 }
 0x443   : > { %v1471_v0 = vpop.permute.xlu0 %1470  ;;  %v1425_v1 = vpop.permute.xlu1 %1424 }
 0x444   : > { %3497 = vmatprep.subr.bf16.mxu0 %v1425_v1  ;;  %1972 = vmatpush1.bf16.msra.mxu1 %v1459_v58  ;;  %v3893_v58 = vld [vmem:[%s5127_s6] sm:$0xff]  }
 0x445   : > { %3498 = vmatpush3.bf16.msra.mxu0 %v4490_v18  ;;  %1973 = vmatprep.subr.bf16.mxu1 %v4139_v15  ;;  %v3829_v18 = vld [vmem:[%s5123_s2 + $0x2c] ss:$16 sps:$4 sm:$0xff]  }
 0x447   : > { %v1473_v2 = vpop.permute.xlu0 %1472  ;;  %v1433_v3 = vpop.permute.xlu1 %1432 }
 0x448   : > { %3499 = vmatprep.subr.bf16.mxu0 %v1433_v3  ;;  %1974 = vmatpush1.bf16.msra.mxu1 %v1461_v62 }
 0x449   : > { %3500 = vmatpush3.bf16.msra.mxu0 %v4492_v23  ;;  %1975 = vmatprep.subr.bf16.mxu1 %v4139_v15  ;;  %v3837_v23 = vld [vmem:[%s5123_s2 + $0x60] ss:$16 sps:$4 sm:$0xff]  }
 0x44b   : > { %v1415_v4 = vpop.permute.xlu0 %1414  ;;  %v1435_v5 = vpop.permute.xlu1 %1434 }
 0x44c   : > { %3501 = vmatprep.subr.bf16.mxu0 %v1435_v5  ;;  %1976 = vmatpush1.bf16.msra.mxu1 %v1469_v60  ;;  %v4140_v60 = vmov 0.0  }
 0x44d   : > { %3502 = vmatpush3.bf16.msra.mxu0 %v4498_v28  ;;  %1977 = vmatprep.subr.bf16.mxu1 %v4139_v15  ;;  %v3844_v28 = vld [vmem:[%s5123_s2 + $0x68] ss:$16 sps:$4 sm:$0xff]  }
 0x44f   : > { %v1437_v6 = vpop.permute.xlu1 %1436  ;;  %v1439_v7 = vpop.permute.xlu0 %1438 }
 0x450   : > { %3503 = vmatprep.subr.bf16.mxu0 %v1437_v6  ;;  %1978 = vmatpush1.bf16.msra.mxu1 %v1471_v0 }
 0x451   : > { %3504 = vmatpush3.bf16.msra.mxu0 %v1415_v4  ;;  %1979 = vmatprep.subr.bf16.mxu1 %v4139_v15 }
 0x452   : > { %3505 = vmatprep.subr.bf16.mxu0 %v1439_v7 }
 0x453   : > { %v1475_v8 = vpop.permute.xlu1 %1474  ;;  %v1477_v12 = vpop.permute.xlu0 %1476 }
 0x454   : > { %1980 = vmatpush1.bf16.msra.mxu1 %v1473_v2 }
 0x455   : > { %1981 = vmatprep.subr.bf16.mxu1 %v4139_v15 }
 0x457   : > { %v1417_v9 = vpop.permute.xlu1 %1416 }
 0x458   : > { %3506 = vmatpush3.bf16.msra.mxu0 %v1417_v9  ;;  %1982 = vmatpush1.bf16.msra.mxu1 %v1475_v8 }
 0x459   : > { %1983 = vmatprep.subr.bf16.mxu1 %v4139_v15  ;;  %2172 = vmatprep.subr.bf16.mxu0 %v4139_v15 }
 0x45b   : > { %1879 = vmatmul.mubr.bf16.vlgmr.msra.gmra.mrb[44].mxu0 %v3818_v10  ;;  %v1479_v13 = vpop.permute.xlu1 %1478 }
 0x45c   : > { %1984 = vmatpush1.bf16.msra.mxu1 %v1477_v12  ;;  %1886 = vmatprep.mubr.bf16.mxu0 %v3821_v11  ;;  %v3895_v12 = vld [vmem:[%s5127_s6 + $0x10] sm:$0xff]  }
 0x45d   : > { %1985 = vmatprep.subr.bf16.mxu1 %v4139_v15 }
 0x460   : > { %1986 = vmatpush1.bf16.msra.mxu1 %v1479_v13 }
 0x461   : > { %3662 = vmatprep.subr.bf16.mxu1 %v4140_v60 }
 0x463   : > { %1887 = vmatmul.mubr.bf16.gmra.mrb[48].mxu0 %v3826_v16  ;;  %1992 = vmatmul.mubr.bf16.vlgmr.msra.gmra.mrb[48].mxu1 %v3823_v14 }
 0x464   : > { %1894 = vmatprep.mubr.bf16.mxu0 %v3827_v17  ;;  %3399 = vmatprep.mubr.msk.bf16.mxu1 %vm525_vm4, %v3829_v18  ;;  %v1529_v59 = vpop.permute.xlu0 %1528  ;;  %v3896_v18 = vld [vmem:[%s5127_s6 + $0x18] sm:$0xff]  }
 0x465   : > { %3663 = vmatpush3.bf16.msra.mxu1 %v3893_v58 }
 0x466   : > { %3664 = vmatprep.subr.bf16.mxu1 %v4140_v60 }
 0x468   : > { %v1539_v14 = vpop.permute.xlu0 %1538 }
 0x469   : > { %3665 = vmatpush3.bf16.msra.mxu1 %v3894_v63 }
 0x46a   : > { %3666 = vmatprep.subr.bf16.mxu1 %v4140_v60 }
 0x46b   : > { %1895 = vmatmul.mubr.bf16.gmra.mrb[52].mxu0 %v3831_v19  ;;  %2000 = vmatmul.mubr.bf16.gmra.mrb[52].mxu1 %v3832_v20 }
 0x46c   : > { %1902 = vmatprep.mubr.bf16.mxu0 %v3833_v21  ;;  %3400 = vmatprep.mubr.msk.bf16.mxu1 %vm525_vm4, %v3835_v22  ;;  %v1534_v61 = vpop.permute.xlu1 %1533 }
 0x46d   : > { %3667 = vmatpush3.bf16.msra.mxu1 %v3895_v12 }
 0x46e   : > { %3668 = vmatprep.subr.bf16.mxu1 %v4140_v60 }
 0x470   : > { %v1544_v16 = vpop.permute.xlu1 %1543 }
 0x471   : > { %3669 = vmatpush3.bf16.msra.mxu1 %v3896_v18 }
 0x472   : > { %3670 = vmatprep.subr.bf16.mxu1 %v4140_v60 }
 0x473   : > { %1903 = vmatmul.mubr.bf16.gmra.mrb[56].mxu0 %v3837_v23  ;;  %2008 = vmatmul.mubr.bf16.gmra.mrb[56].mxu1 %v3838_v24 }
 0x474   : > { %1910 = vmatprep.mubr.bf16.mxu0 %v3839_v25  ;;  %3401 = vmatprep.mubr.msk.bf16.mxu1 %vm525_vm4, %v3841_v26 }
 0x47b   : > { %1911 = vmatmul.mubr.bf16.gmra.mrb[60].mxu0 %v3843_v27  ;;  %2016 = vmatmul.mubr.bf16.gmra.mrb[60].mxu1 %v3844_v28 }
 0x47c   : > { %1918 = vmatprep.mubr.bf16.mxu0 %v3845_v29  ;;  %3402 = vmatprep.mubr.msk.bf16.mxu1 %vm525_vm4, %v3847_v30 }
 0x483   : > { %1919 = vmatmul.mubr.bf16.gmra.mrb[64].mxu0 %v3849_v31  ;;  %2024 = vmatmul.mubr.bf16.gmra.mrb[64].mxu1 %v3850_v32 }
 0x484   : > { %1926 = vmatprep.mubr.bf16.mxu0 %v3851_v33  ;;  %3403 = vmatprep.mubr.msk.bf16.mxu1 %vm525_vm4, %v3853_v34  ;;  %v1549_v33 = vpop.permute.xlu0 %1548 }
 0x48b   : > { %1927 = vmatmul.mubr.bf16.gmra.mrb[68].mxu0 %v3855_v35  ;;  %2032 = vmatmul.mubr.bf16.gmra.mrb[68].mxu1 %v3856_v36  ;;  %v1554_v35 = vpop.permute.xlu1 %1553 }
 0x48c   : > { %1934 = vmatprep.mubr.bf16.mxu0 %v3857_v37  ;;  %3404 = vmatprep.mubr.msk.bf16.mxu1 %vm525_vm4, %v3859_v38 }
 0x493   : > { %1935 = vmatmul.mubr.bf16.gmra.mrb[72].mxu0 %v3861_v39  ;;  %2040 = vmatmul.mubr.bf16.gmra.mrb[72].mxu1 %v3862_v40 }
 0x494   : > { %1942 = vmatprep.mubr.bf16.mxu0 %v3863_v41  ;;  %3405 = vmatprep.mubr.msk.bf16.mxu1 %vm525_vm4, %v3865_v42 }
 0x49b   : > { %1943 = vmatmul.mubr.bf16.gmra.mrb[76].mxu0 %v3867_v43  ;;  %2048 = vmatmul.mubr.bf16.gmra.mrb[76].mxu1 %v3868_v44 }
 0x49c   : > { %1950 = vmatprep.mubr.bf16.mxu0 %v3869_v45  ;;  %3406 = vmatprep.mubr.msk.bf16.mxu1 %vm525_vm4, %v3871_v46 }
 0x4a3   : > { %1951 = vmatmul.mubr.bf16.gmra.mrb[80].mxu0 %v3873_v47  ;;  %2056 = vmatmul.mubr.bf16.gmra.mrb[80].mxu1 %v3874_v48 }
 0x4a4   : > { %3407 = vmatprep.mubr.msk.bf16.mxu1 %vm525_vm4, %v3875_v49  ;;  %3418 = vmatprep.mubr.msk.bf16.mxu0 %vm754_vm0, %v3880_v51 }
 0x4ab   : > { %2064 = vmatmul.mubr.bf16.gmra.mrb[84].mxu1 %v3877_v50 }
 0x4ac   : > { %3672 = vmatprep.mubr.msk.bf16.mxu1 %vm4141_vm7, %v4140_v60 }
 0x52e   : > { %v3507_v52 = vpop.f32.mrb[44].mxu0 }
 0x52f   : > { %v3508_v53 = vpop.f32.mrb[45].mxu0 }
 0x530   : > { %v3509_v54 = vadd.f32 %v3508_v53, %v3507_v52  ;;  %v3510_v55 = vpop.f32.mrb[46].mxu0  ;;  %v1559_v52 = vpop.permute.xlu0 %1558 }
 0x531   : > { %v3511_v56 = vpop.f32.mrb[47].mxu0 }
 0x532   : > { %v3512_v57 = vadd.f32 %v3511_v56, %v3510_v55  ;;  %v1881_v62 = vadd.f32 %v3509_v54, %v1529_v59  ;;  %v1564_v54 = vpop.permute.xlu1 %1563 }
 0x534   : > { %v1884_v5 = vadd.f32 %v3512_v57, %v1534_v61 }
 0x536   : > { %v3513_v0 = vpop.f32.mrb[48].mxu0  ;;  %v1993_v1 = vpop.f32.mrb[48].mxu1 }
 0x537   : > { %v1994_v2 = vadd.f32 %v1993_v1, %v1881_v62  ;;  %v3514_v3 = vpop.f32.mrb[49].mxu0  ;;  %v1995_v4 = vpop.f32.mrb[49].mxu1 }
 0x538   : > { %v3515_v6 = vadd.f32 %v3514_v3, %v3513_v0  ;;  %v3516_v7 = vpop.f32.mrb[50].mxu0  ;;  %v1996_v8 = vpop.f32.mrb[50].mxu1 }
 0x539   : > { %v1997_v9 = vadd.f32 %v1996_v8, %v1884_v5  ;;  %v3517_v10 = vpop.f32.mrb[51].mxu0  ;;  %v1998_v11 = vpop.f32.mrb[51].mxu1  ;;  %4035 = vtanh.f32 %v1994_v2 }
 0x53a   : > { %v3518_v13 = vadd.f32 %v3517_v10, %v3516_v7  ;;  %v1889_v17 = vadd.f32 %v3515_v6, %v1539_v14  ;;  %v1569_v8 = vpop.permute.xlu0 %1568  ;;  %v1574_v10 = vpop.permute.xlu1 %1573 }
 0x53b   : > { %4037 = vtanh.f32 %v1997_v9 }
 0x53c   : > { %v1892_v24 = vadd.f32 %v3518_v13, %v1544_v16 }
 0x53e   : > { %v3519_v19 = vpop.f32.mrb[52].mxu0  ;;  %v2001_v20 = vpop.f32.mrb[52].mxu1 }
 0x53f   : > { %v2002_v21 = vadd.f32 %v2001_v20, %v1889_v17  ;;  %v3520_v22 = vpop.f32.mrb[53].mxu0  ;;  %v2003_v23 = vpop.f32.mrb[53].mxu1 }
 0x540   : > { %v3521_v25 = vadd.f32 %v3520_v22, %v3519_v19  ;;  %v3522_v26 = vpop.f32.mrb[54].mxu0  ;;  %v2004_v27 = vpop.f32.mrb[54].mxu1 }
 0x541   : > { %v2005_v28 = vadd.f32 %v2004_v27, %v1892_v24  ;;  %v3523_v29 = vpop.f32.mrb[55].mxu0  ;;  %v2006_v30 = vpop.f32.mrb[55].mxu1  ;;  %4039 = vtanh.f32 %v2002_v21 }
 0x542   : > { %v3524_v31 = vadd.f32 %v3523_v29, %v3522_v26  ;;  %v1897_v36 = vadd.f32 %v3521_v25, %v1549_v33  ;;  %v1584_v30 = vpop.permute.xlu1 %1583 }
 0x543   : > { %4041 = vtanh.f32 %v2005_v28  ;;  %v4036_v32 = vpop.eup %4035  ;;  %v1579_v28 = vpop.permute.xlu0 %1578 }
 0x544   : > { %v1900_v43 = vadd.f32 %v3524_v31, %v1554_v35 }
 0x545   : > { %v4038_v34 = vpop.eup %4037 }
 0x546   : > { %v3525_v37 = vpop.f32.mrb[56].mxu0  ;;  %v2009_v38 = vpop.f32.mrb[56].mxu1  ;;  %v2102_v39 = vpack.c.bf16 %v4038_v34, %v4036_v32 }
 0x547   : > { %v2010_v40 = vadd.f32 %v2009_v38, %v1897_v36  ;;  %v3526_v41 = vpop.f32.mrb[57].mxu0  ;;  %v2011_v42 = vpop.f32.mrb[57].mxu1 }
 0x548   : > { %v3527_v44 = vadd.f32 %v3526_v41, %v3525_v37  ;;  %v3528_v45 = vpop.f32.mrb[58].mxu0  ;;  %v2012_v46 = vpop.f32.mrb[58].mxu1  ;;  %2173 = vmatpush1.bf16.msra.mxu0 %v2102_v39 }
 0x549   : > { %v2013_v47 = vadd.f32 %v2012_v46, %v1900_v43  ;;  %v3529_v48 = vpop.f32.mrb[59].mxu0  ;;  %v2014_v49 = vpop.f32.mrb[59].mxu1  ;;  %2174 = vmatprep.subr.bf16.mxu0 %v4139_v15  ;;  %4043 = vtanh.f32 %v2010_v40 }
 0x54a   : > { %v3530_v50 = vadd.f32 %v3529_v48, %v3528_v45  ;;  %v1905_v55 = vadd.f32 %v3527_v44, %v1559_v52  ;;  %v1594_v49 = vpop.permute.xlu1 %1593 }
 0x54b   : > { %4045 = vtanh.f32 %v2013_v47  ;;  %v4040_v51 = vpop.eup %4039  ;;  %v1589_v47 = vpop.permute.xlu0 %1588 }
 0x54c   : > { %v1908_v63 = vadd.f32 %v3530_v50, %v1564_v54 }
 0x54d   : > { %v4042_v53 = vpop.eup %4041 }
 0x54e   : > { %v3531_v56 = vpop.f32.mrb[60].mxu0  ;;  %v2017_v57 = vpop.f32.mrb[60].mxu1  ;;  %v2103_v58 = vpack.c.bf16 %v4042_v53, %v4040_v51 }
 0x54f   : > { %v2018_v59 = vadd.f32 %v2017_v57, %v1905_v55  ;;  %v3532_v61 = vpop.f32.mrb[61].mxu0  ;;  %v2019_v62 = vpop.f32.mrb[61].mxu1 }
 0x550   : > { %v3533_v0 = vadd.f32 %v3532_v61, %v3531_v56  ;;  %v3534_v1 = vpop.f32.mrb[62].mxu0  ;;  %v2020_v2 = vpop.f32.mrb[62].mxu1  ;;  %2175 = vmatpush1.bf16.msra.mxu0 %v2103_v58 }
 0x551   : > { %v2021_v3 = vadd.f32 %v2020_v2, %v1908_v63  ;;  %v3535_v4 = vpop.f32.mrb[63].mxu0  ;;  %v2022_v5 = vpop.f32.mrb[63].mxu1  ;;  %2176 = vmatprep.subr.bf16.mxu0 %v4139_v15  ;;  %4047 = vtanh.f32 %v2018_v59 }
 0x552   : > { %v3536_v6 = vadd.f32 %v3535_v4, %v3534_v1  ;;  %v1913_v11 = vadd.f32 %v3533_v0, %v1569_v8  ;;  %v1604_v5 = vpop.permute.xlu1 %1603 }
 0x553   : > { %4049 = vtanh.f32 %v2021_v3  ;;  %v4044_v7 = vpop.eup %4043  ;;  %v1599_v3 = vpop.permute.xlu0 %1598 }
 0x554   : > { %v1916_v19 = vadd.f32 %v3536_v6, %v1574_v10 }
 0x555   : > { %v4046_v9 = vpop.eup %4045 }
 0x556   : > { %v3537_v12 = vpop.f32.mrb[64].mxu0  ;;  %v2025_v13 = vpop.f32.mrb[64].mxu1  ;;  %v2104_v14 = vpack.c.bf16 %v4046_v9, %v4044_v7 }
 0x557   : > { %v2026_v16 = vadd.f32 %v2025_v13, %v1913_v11  ;;  %v3538_v17 = vpop.f32.mrb[65].mxu0  ;;  %v2027_v18 = vpop.f32.mrb[65].mxu1 }
 0x558   : > { %v3539_v20 = vadd.f32 %v3538_v17, %v3537_v12  ;;  %v3540_v21 = vpop.f32.mrb[66].mxu0  ;;  %v2028_v22 = vpop.f32.mrb[66].mxu1  ;;  %2177 = vmatpush1.bf16.msra.mxu0 %v2104_v14 }
 0x559   : > { %v2029_v23 = vadd.f32 %v2028_v22, %v1916_v19  ;;  %v3541_v24 = vpop.f32.mrb[67].mxu0  ;;  %v2030_v25 = vpop.f32.mrb[67].mxu1  ;;  %2178 = vmatprep.subr.bf16.mxu0 %v4139_v15  ;;  %4051 = vtanh.f32 %v2026_v16 }
 0x55a   : > { %v3542_v26 = vadd.f32 %v3541_v24, %v3540_v21  ;;  %v1921_v31 = vadd.f32 %v3539_v20, %v1579_v28  ;;  %v1614_v25 = vpop.permute.xlu1 %1613 }
 0x55b   : > { %4053 = vtanh.f32 %v2029_v23  ;;  %v4048_v27 = vpop.eup %4047  ;;  %v1609_v23 = vpop.permute.xlu0 %1608 }
 0x55c   : > { %v1924_v38 = vadd.f32 %v3542_v26, %v1584_v30 }
 0x55d   : > { %v4050_v29 = vpop.eup %4049 }
 0x55e   : > { %v3543_v32 = vpop.f32.mrb[68].mxu0  ;;  %v2033_v33 = vpop.f32.mrb[68].mxu1  ;;  %v2105_v34 = vpack.c.bf16 %v4050_v29, %v4048_v27 }
 0x55f   : > { %v2034_v35 = vadd.f32 %v2033_v33, %v1921_v31  ;;  %v3544_v36 = vpop.f32.mrb[69].mxu0  ;;  %v2035_v37 = vpop.f32.mrb[69].mxu1 }
 0x560   : > { %v3545_v39 = vadd.f32 %v3544_v36, %v3543_v32  ;;  %v3546_v40 = vpop.f32.mrb[70].mxu0  ;;  %v2036_v41 = vpop.f32.mrb[70].mxu1  ;;  %2179 = vmatpush1.bf16.msra.mxu0 %v2105_v34 }
 0x561   : > { %v2037_v42 = vadd.f32 %v2036_v41, %v1924_v38  ;;  %v3547_v43 = vpop.f32.mrb[71].mxu0  ;;  %v2038_v44 = vpop.f32.mrb[71].mxu1  ;;  %2180 = vmatprep.subr.bf16.mxu0 %v4139_v15  ;;  %4055 = vtanh.f32 %v2034_v35 }
 0x562   : > { %v3548_v45 = vadd.f32 %v3547_v43, %v3546_v40  ;;  %v1929_v50 = vadd.f32 %v3545_v39, %v1589_v47 }
 0x563   : > { %4057 = vtanh.f32 %v2037_v42  ;;  %v4052_v46 = vpop.eup %4051  ;;  %v1619_v42 = vpop.permute.xlu0 %1618 }
 0x564   : > { %v1932_v57 = vadd.f32 %v3548_v45, %v1594_v49  ;;  %v1624_v45 = vpop.permute.xlu1 %1623 }
 0x565   : > { %v4054_v48 = vpop.eup %4053 }
 0x566   : > { %v3549_v51 = vpop.f32.mrb[72].mxu0  ;;  %v2041_v52 = vpop.f32.mrb[72].mxu1  ;;  %v2106_v53 = vpack.c.bf16 %v4054_v48, %v4052_v46 }
 0x567   : > { %v2042_v54 = vadd.f32 %v2041_v52, %v1929_v50  ;;  %v3550_v55 = vpop.f32.mrb[73].mxu0  ;;  %v2043_v56 = vpop.f32.mrb[73].mxu1 }
 0x568   : > { %v3551_v58 = vadd.f32 %v3550_v55, %v3549_v51  ;;  %v3552_v59 = vpop.f32.mrb[74].mxu0  ;;  %v2044_v61 = vpop.f32.mrb[74].mxu1  ;;  %2181 = vmatpush1.bf16.msra.mxu0 %v2106_v53 }
 0x569   : > { %v2045_v62 = vadd.f32 %v2044_v61, %v1932_v57  ;;  %v3553_v63 = vpop.f32.mrb[75].mxu0  ;;  %v2046_v0 = vpop.f32.mrb[75].mxu1  ;;  %2182 = vmatprep.subr.bf16.mxu0 %v4139_v15  ;;  %4059 = vtanh.f32 %v2042_v54  ;;  %v3878_v61 = vld [vmem:[%s5126_s5] ss:$8 sps:$4 sm:$0xff]  }
 0x56a   : > { %v3554_v1 = vadd.f32 %v3553_v63, %v3552_v59  ;;  %v1937_v6 = vadd.f32 %v3551_v58, %v1599_v3  ;;  %v3883_v63 = vld [vmem:[%s5126_s5 + $0x10] ss:$8 sps:$4 sm:$0xff]   ;;  %v3884_v0 = vld [vmem:[%s5126_s5 + $0x24] ss:$8 sps:$4 sm:$0xff]  }
 0x56b   : > { %4061 = vtanh.f32 %v2045_v62  ;;  %v4056_v2 = vpop.eup %4055  ;;  %v3881_v62 = vld [vmem:[%s5126_s5 + $0x14] ss:$8 sps:$4 sm:$0xff]   ;;  %v3889_v3 = vld [vmem:[%s5126_s5 + $0x30] ss:$8 sps:$4 sm:$0xff]  }
 0x56c   : > { %v1940_v13 = vadd.f32 %v3554_v1, %v1604_v5  ;;  %v3886_v1 = vld [vmem:[%s5126_s5 + $0x20] ss:$8 sps:$4 sm:$0xff]  }
 0x56d   : > { %v4058_v4 = vpop.eup %4057  ;;  %v3892_v5 = vld [vmem:[%s5126_s5 + $0x40] ss:$8 sps:$4 sm:$0xff]  }
 0x56e   : > { %v3555_v7 = vpop.f32.mrb[76].mxu0  ;;  %v2049_v8 = vpop.f32.mrb[76].mxu1  ;;  %v2107_v9 = vpack.c.bf16 %v4058_v4, %v4056_v2  ;;  %v3887_v2 = vld [vmem:[%s5126_s5 + $0x34] ss:$8 sps:$4 sm:$0xff]   ;;  %v3890_v4 = vld [vmem:[%s5126_s5 + $0x44] ss:$8 sps:$4 sm:$0xff]  }
 0x56f   : > { %v2050_v10 = vadd.f32 %v2049_v8, %v1937_v6  ;;  %v3556_v11 = vpop.f32.mrb[77].mxu0  ;;  %v2051_v12 = vpop.f32.mrb[77].mxu1  ;;  %v3897_v6 = vld [vmem:[%s5127_s6 + $0x20] sm:$0xff]  }
 0x570   : > { %v3557_v14 = vadd.f32 %v3556_v11, %v3555_v7  ;;  %v3558_v16 = vpop.f32.mrb[78].mxu0  ;;  %v2052_v17 = vpop.f32.mrb[78].mxu1  ;;  %2183 = vmatpush1.bf16.msra.mxu0 %v2107_v9  ;;  %3671 = vmatpush3.bf16.msra.mxu1 %v3897_v6  ;;  %v435_v6 = vld [vmem:[%s5131_s10 + $0x178] sm:$0xff] }
 0x571   : > { %v2053_v18 = vadd.f32 %v2052_v17, %v1940_v13  ;;  %v3559_v19 = vpop.f32.mrb[79].mxu0  ;;  %v2054_v20 = vpop.f32.mrb[79].mxu1  ;;  %2184 = vmatprep.subr.bf16.mxu0 %v4139_v15  ;;  %4063 = vtanh.f32 %v2050_v10  ;;  %2821 = vmatprep.subr.bf16.mxu1 %v4139_v15 }
 0x572   : > { %v3560_v21 = vadd.f32 %v3559_v19, %v3558_v16  ;;  %v1945_v26 = vadd.f32 %v3557_v14, %v1609_v23 }
 0x573   : > { %4065 = vtanh.f32 %v2053_v18  ;;  %v4060_v22 = vpop.eup %4059 }
 0x574   : > { %v1948_v33 = vadd.f32 %v3560_v21, %v1614_v25 }
 0x575   : > { %v4062_v24 = vpop.eup %4061 }
 0x576   : > { %v3561_v27 = vpop.f32.mrb[80].mxu0  ;;  %v2057_v28 = vpop.f32.mrb[80].mxu1  ;;  %v2108_v29 = vpack.c.bf16 %v4062_v24, %v4060_v22 }
 0x577   : > { %v2058_v30 = vadd.f32 %v2057_v28, %v1945_v26  ;;  %v3562_v31 = vpop.f32.mrb[81].mxu0  ;;  %v2059_v32 = vpop.f32.mrb[81].mxu1 }
 0x578   : > { %v3563_v34 = vadd.f32 %v3562_v31, %v3561_v27  ;;  %v3564_v35 = vpop.f32.mrb[82].mxu0  ;;  %v2060_v36 = vpop.f32.mrb[82].mxu1  ;;  %2185 = vmatpush1.bf16.msra.mxu0 %v2108_v29 }
 0x579   : > { %v2061_v37 = vadd.f32 %v2060_v36, %v1948_v33  ;;  %v3565_v38 = vpop.f32.mrb[83].mxu0  ;;  %v2062_v39 = vpop.f32.mrb[83].mxu1  ;;  %2186 = vmatprep.subr.bf16.mxu0 %v4139_v15  ;;  %4067 = vtanh.f32 %v2058_v30 }
 0x57a   : > { %v3566_v40 = vadd.f32 %v3565_v38, %v3564_v35  ;;  %v1953_v44 = vadd.f32 %v3563_v34, %v1619_v42 }
 0x57b   : > { %4069 = vtanh.f32 %v2061_v37  ;;  %v4064_v41 = vpop.eup %4063 }
 0x57c   : > { %v1956_v50 = vadd.f32 %v3566_v40, %v1624_v45 }
 0x57d   : > { %v4066_v43 = vpop.eup %4065 }
 0x57e   : > { %v2065_v46 = vpop.f32.mrb[84].mxu1  ;;  %v2109_v47 = vpack.c.bf16 %v4066_v43, %v4064_v41 }
 0x57f   : > { %v2066_v48 = vadd.f32 %v2065_v46, %v1953_v44  ;;  %v2067_v49 = vpop.f32.mrb[85].mxu1 }
 0x580   : > { %v2068_v51 = vpop.f32.mrb[86].mxu1  ;;  %2187 = vmatpush1.bf16.msra.mxu0 %v2109_v47 }
 0x581   : > { %v2069_v52 = vadd.f32 %v2068_v51, %v1956_v50  ;;  %2188 = vmatprep.subr.bf16.mxu0 %v4139_v15  ;;  %v2070_v53 = vpop.f32.mrb[87].mxu1  ;;  %4071 = vtanh.f32 %v2066_v48 }
 0x583   : > { %4073 = vtanh.f32 %v2069_v52  ;;  %v4068_v54 = vpop.eup %4067 }
 0x585   : > { %v4070_v55 = vpop.eup %4069 }
 0x586   : > { %v2110_v56 = vpack.c.bf16 %v4070_v55, %v4068_v54 }
 0x588   : > { %2189 = vmatpush1.bf16.msra.mxu0 %v2110_v56 }
 0x589   : > { %2190 = vmatprep.subr.bf16.mxu0 %v4139_v15 }
 0x58b   : > { %v4072_v57 = vpop.eup %4071 }
 0x58d   : > { %v4074_v58 = vpop.eup %4073 }
 0x58e   : > { %v2111_v59 = vpack.c.bf16 %v4074_v58, %v4072_v57  ;;  %v3900_v58 = vld [vmem:[%s5128_s7 + $0x4] ss:$16 sps:$4 sm:$0xff]  }
 0x590   : > { %2191 = vmatpush1.bf16.msra.mxu0 %v2111_v59  ;;  %v3903_v59 = vld [vmem:[%s5128_s7 + $0xc] ss:$16 sps:$4 sm:$0xff]  }
 0x593   : > { %2205 = vmatmul.mubr.bf16.vlgmr.msra.gmra.mrb[84].mxu0 %v3878_v61  ;;  %v430_v61 = vld [vmem:[%s5131_s10 + $0x150] sm:$0xff] }
 0x594   : > { %3419 = vmatprep.mubr.msk.bf16.mxu0 %vm754_vm0, %v3881_v62  ;;  %v432_v62 = vld [vmem:[%s5131_s10 + $0x160] sm:$0xff] }
 0x59b   : > { %2213 = vmatmul.mubr.bf16.gmra.mrb[88].mxu0 %v3883_v63  ;;  %v434_v63 = vld [vmem:[%s5131_s10 + $0x170] sm:$0xff] }
 0x59c   : > { %3420 = vmatprep.mubr.msk.bf16.mxu0 %vm754_vm0, %v3884_v0  ;;  %v429_v0 = vld [vmem:[%s5131_s10 + $0x148] sm:$0xff] }
 0x5a3   : > { %2221 = vmatmul.mubr.bf16.gmra.mrb[92].mxu0 %v3886_v1  ;;  %v436_v1 = vld [vmem:[%s5131_s10 + $0x180] sm:$0xff] }
 0x5a4   : > { %3421 = vmatprep.mubr.msk.bf16.mxu0 %vm754_vm0, %v3887_v2  ;;  %v431_v2 = vld [vmem:[%s5131_s10 + $0x158] sm:$0xff] }
 0x5ab   : > { %2229 = vmatmul.mubr.bf16.gmra.mrb[96].mxu0 %v3889_v3  ;;  %v438_v3 = vld [vmem:[%s5131_s10 + $0x190] sm:$0xff] }
 0x5ac   : > { %3422 = vmatprep.mubr.msk.bf16.mxu0 %vm754_vm0, %v3890_v4  ;;  %v433_v4 = vld [vmem:[%s5131_s10 + $0x168] sm:$0xff] }
 0x5b3   : > { %2237 = vmatmul.mubr.bf16.gmra.mrb[100].mxu0 %v3892_v5  ;;  %v440_v5 = vld [vmem:[%s5131_s10 + $0x1a0] sm:$0xff] }
 0x5b4   : > { %2757 = vmatprep.mubr.bf16.mxu0 %v3900_v58  ;;  %v3923_v58 = vld [vmem:[%s5128_s7 + $0x68] ss:$16 sps:$4 sm:$0xff]  }
 0x666   : > { %v2206_v7 = vpop.f32.mrb[84].mxu0 }
 0x667   : > { %v2208_v8 = vpop.f32.mrb[85].mxu0 }
 0x668   : > { %v2209_v9 = vpop.f32.mrb[86].mxu0  ;;  %v437_v8 = vld [vmem:[%s5131_s10 + $0x188] sm:$0xff] }
 0x669   : > { %v2245_v10 = vpack.c.bf16 %v2209_v9, %v2206_v7  ;;  %v2211_v11 = vpop.f32.mrb[87].mxu0  ;;  %v442_v7 = vld [vmem:[%s5131_s10 + $0x1b0] sm:$0xff]  ;;  %v444_v9 = vld [vmem:[%s5131_s10 + $0x1c0] sm:$0xff] }
 0x66a   : > { %v446_v11 = vld [vmem:[%s5131_s10 + $0x1d0] sm:$0xff] }
 0x66b   : > { %3673 = vmatmul.mubr.msk.bf16.vlgmr.msra.gmra.mrb[88].mxu1 %vm2290_vm8, %v2245_v10  ;;  %v439_v10 = vld [vmem:[%s5131_s10 + $0x198] sm:$0xff] }
 0x66c   : > { %3676 = vmatprep.mubr.msk.bf16.mxu1 %vm4141_vm7, %v4140_v60 }
 0x66e   : > { %v2214_v12 = vpop.f32.mrb[88].mxu0 }
 0x66f   : > { %v2216_v13 = vpop.f32.mrb[89].mxu0 }
 0x670   : > { %v2217_v14 = vpop.f32.mrb[90].mxu0  ;;  %v448_v13 = vld [vmem:[%s5131_s10 + $0x1e0] sm:$0xff] }
 0x671   : > { %v2246_v16 = vpack.c.bf16 %v2217_v14, %v2214_v12  ;;  %v2219_v17 = vpop.f32.mrb[91].mxu0  ;;  %v441_v12 = vld [vmem:[%s5131_s10 + $0x1a8] sm:$0xff]  ;;  %v443_v14 = vld [vmem:[%s5131_s10 + $0x1b8] sm:$0xff] }
 0x672   : > { %v445_v17 = vld [vmem:[%s5131_s10 + $0x1c8] sm:$0xff] }
 0x673   : > { %3677 = vmatmul.mubr.msk.bf16.gmra.mrb[92].mxu1 %vm2290_vm8, %v2246_v16  ;;  %v450_v16 = vld [vmem:[%s5131_s10 + $0x1f0] sm:$0xff] }
 0x674   : > { %3680 = vmatprep.mubr.msk.bf16.mxu1 %vm4141_vm7, %v4140_v60 }
 0x676   : > { %v2222_v18 = vpop.f32.mrb[92].mxu0 }
 0x677   : > { %v2224_v19 = vpop.f32.mrb[93].mxu0 }
 0x678   : > { %v2225_v20 = vpop.f32.mrb[94].mxu0  ;;  %v447_v19 = vld [vmem:[%s5131_s10 + $0x1d8] sm:$0xff] }
 0x679   : > { %v2247_v21 = vpack.c.bf16 %v2225_v20, %v2222_v18  ;;  %v2227_v22 = vpop.f32.mrb[95].mxu0  ;;  %v452_v18 = vld [vmem:[%s5131_s10 + $0x200] sm:$0xff]  ;;  %v454_v20 = vld [vmem:[%s5131_s10 + $0x210] sm:$0xff] }
 0x67a   : > { %v451_v22 = vld [vmem:[%s5131_s10 + $0x1f8] sm:$0xff] }
 0x67b   : > { %3681 = vmatmul.mubr.msk.bf16.gmra.mrb[96].mxu1 %vm2290_vm8, %v2247_v21  ;;  %v449_v21 = vld [vmem:[%s5131_s10 + $0x1e8] sm:$0xff] }
 0x67c   : > { %3684 = vmatprep.mubr.msk.bf16.mxu1 %vm4141_vm7, %v4140_v60 }
 0x67e   : > { %v2230_v23 = vpop.f32.mrb[96].mxu0 }
 0x67f   : > { %v2232_v24 = vpop.f32.mrb[97].mxu0 }
 0x680   : > { %v2233_v25 = vpop.f32.mrb[98].mxu0  ;;  %v455_v24 = vld [vmem:[%s5131_s10 + $0x218] sm:$0x3f] }
 0x681   : > { %v2248_v26 = vpack.c.bf16 %v2233_v25, %v2230_v23  ;;  %v2235_v27 = vpop.f32.mrb[99].mxu0  ;;  %v453_v23 = vld [vmem:[%s5131_s10 + $0x208] sm:$0xff] }
 0x683   : > { %3685 = vmatmul.mubr.msk.bf16.gmra.mrb[100].mxu1 %vm2290_vm8, %v2248_v26 }
 0x684   : > { %3688 = vmatprep.mubr.msk.bf16.mxu1 %vm4141_vm7, %v4140_v60 }
 0x686   : > { %v2238_v28 = vpop.f32.mrb[100].mxu0 }
 0x687   : > { %v2240_v29 = vpop.f32.mrb[101].mxu0 }
 0x688   : > { %v2241_v30 = vpop.f32.mrb[102].mxu0 }
 0x689   : > { %v2249_v31 = vpack.c.bf16 %v2241_v30, %v2238_v28  ;;  %v2243_v32 = vpop.f32.mrb[103].mxu0 }
 0x68b   : > { %3689 = vmatmul.mubr.msk.bf16.gmra.mrb[104].mxu1 %vm2290_vm8, %v2249_v31 }
 0x68c   : > { %3465 = vmatprep.mubr.msk.bf16.mxu1 %vm2700_vm9, %v3903_v59  ;;  %v3924_v59 = vld [vmem:[%s5128_s7 + $0x80] ss:$16 sps:$4 sm:$0xff]  }
 0x73e   : > { %v2340_v33 = vpop.f32.mrb[88].mxu1 }
 0x73f   : > { %v3674_v34 = vpop.f32.mrb[89].mxu1 }
 0x740   : > { %v2343_v35 = vpop.f32.mrb[90].mxu1 }
 0x741   : > { %v4834_v36 = vpack.c.bf16 %v2343_v35, %v2340_v33  ;;  %v3675_v37 = vpop.f32.mrb[91].mxu1 }
 0x743   : > { %2404 = vrot.lane.b32.xlu0 %v4834_v36, %s4136_s24 }
 0x746   : > { %v2348_v38 = vpop.f32.mrb[92].mxu1 }
 0x747   : > { %v3678_v39 = vpop.f32.mrb[93].mxu1 }
 0x748   : > { %v2351_v40 = vpop.f32.mrb[94].mxu1 }
 0x749   : > { %v4838_v41 = vpack.c.bf16 %v2351_v40, %v2348_v38  ;;  %v3679_v42 = vpop.f32.mrb[95].mxu1 }
 0x74b   : > { %2421 = vrot.lane.b32.xlu1 %v4838_v41, %s4137_s25 }
 0x74e   : > { %v2356_v43 = vpop.f32.mrb[96].mxu1 }
 0x74f   : > { %v3682_v44 = vpop.f32.mrb[97].mxu1 }
 0x750   : > { %v2359_v45 = vpop.f32.mrb[98].mxu1  ;;  %v3904_v44 = vld [vmem:[%s5128_s7 + $0x24] ss:$16 sps:$4 sm:$0xff]  }
 0x751   : > { %v4842_v46 = vpack.c.bf16 %v2359_v45, %v2356_v43  ;;  %v3683_v47 = vpop.f32.mrb[99].mxu1  ;;  %v3898_v43 = vld [vmem:[%s5128_s7] ss:$16 sps:$4 sm:$0xff]  }
 0x752   : > { %v3901_v47 = vld [vmem:[%s5128_s7 + $0x8] ss:$16 sps:$4 sm:$0xff]  }
 0x753   : > { %2423 = vrot.lane.b32.xlu1 %v4842_v46, %s4137_s25 }
 0x756   : > { %v2364_v48 = vpop.f32.mrb[100].mxu1 }
 0x757   : > { %v3686_v49 = vpop.f32.mrb[101].mxu1 }
 0x758   : > { %v2367_v50 = vpop.f32.mrb[102].mxu1  ;;  %v3907_v49 = vld [vmem:[%s5128_s7 + $0x2c] ss:$16 sps:$4 sm:$0xff]  }
 0x759   : > { %v4846_v51 = vpack.c.bf16 %v2367_v50, %v2364_v48  ;;  %v3687_v52 = vpop.f32.mrb[103].mxu1  ;;  %v3906_v48 = vld [vmem:[%s5128_s7 + $0x20] ss:$16 sps:$4 sm:$0xff]   ;;  %v3909_v50 = vld [vmem:[%s5128_s7 + $0x44] ss:$16 sps:$4 sm:$0xff]  }
 0x75a   : > { %v3913_v52 = vld [vmem:[%s5128_s7 + $0x4c] ss:$16 sps:$4 sm:$0xff]  }
 0x75b   : > { %2425 = vrot.lane.b32.xlu1 %v4846_v51, %s4137_s25  ;;  %2395 = vrot.lane.b32.xlu0 %v4846_v51, %s4135_s23 }
 0x75e   : > { %v2372_v53 = vpop.f32.mrb[104].mxu1 }
 0x75f   : > { %2434 = vrot.lane.b32.xlu1 %v4834_v36, %s4138_s28  ;;  %v3690_v54 = vpop.f32.mrb[105].mxu1 }
 0x760   : > { %v2375_v55 = vpop.f32.mrb[106].mxu1  ;;  %v3917_v54 = vld [vmem:[%s5128_s7 + $0x48] ss:$16 sps:$4 sm:$0xff]  }
 0x761   : > { %v4854_v56 = vpack.c.bf16 %v2375_v55, %v2372_v53  ;;  %v3691_v57 = vpop.f32.mrb[107].mxu1  ;;  %v3915_v53 = vld [vmem:[%s5128_s7 + $0x64] ss:$16 sps:$4 sm:$0xff]   ;;  %v3918_v55 = vld [vmem:[%s5128_s7 + $0x60] ss:$16 sps:$4 sm:$0xff]  }
 0x762   : > { %v3921_v57 = vld [vmem:[%s5128_s7 + $0x84] ss:$16 sps:$4 sm:$0xff]  }
 0x763   : > { %2427 = vrot.lane.b32.xlu1 %v4854_v56, %s4137_s25  ;;  %2397 = vrot.lane.b32.xlu0 %v4854_v56, %s4135_s23 }
 0x767   : > { %2389 = vrot.lane.b32.xlu1 %v4834_v36, %s4135_s23  ;;  %2406 = vrot.lane.b32.xlu0 %v4838_v41, %s4136_s24 }
 0x76b   : > { %2412 = vrot.lane.b32.xlu1 %v4854_v56, %s4136_s24  ;;  %2408 = vrot.lane.b32.xlu0 %v4842_v46, %s4136_s24 }
 0x76f   : > { %2438 = vrot.lane.b32.xlu1 %v4842_v46, %s4138_s28  ;;  %2410 = vrot.lane.b32.xlu0 %v4846_v51, %s4136_s24 }
 0x773   : > { %2393 = vrot.lane.b32.xlu1 %v4842_v46, %s4135_s23  ;;  %2436 = vrot.lane.b32.xlu0 %v4838_v41, %s4138_s28 }
 0x777   : > { %2442 = vrot.lane.b32.xlu1 %v4854_v56, %s4138_s28  ;;  %2391 = vrot.lane.b32.xlu0 %v4838_v41, %s4135_s23  ;;  %s3490_s23 = sshll.u32 %s5134_s18, 4 }
 0x778   : > { %s386_s20 = scalar_lea.vmem %s5132_s11, %s3490_s23 }
 0x77b   : > { %2486 = vperm.xlu1 %3753, %v430_v61   ;;  %2419 = vrot.lane.b32.xlu0 %v4834_v36, %s4137_s25  ;;  %v3925_v61 = vld [vmem:[%s5128_s7 + $0x8c] ss:$16 sps:$4 sm:$0xff]  }
 0x77f   : > { %2496 = vperm.xlu1 %3753, %v432_v62   ;;  %2440 = vrot.lane.b32.xlu0 %v4846_v51, %s4138_s28  ;;  %v3927_v62 = vld [vmem:[%s5128_s7 + $0xa4] ss:$16 sps:$4 sm:$0xff]  }
 0x783   : > { %2506 = vperm.xlu1 %3753, %v434_v63   ;;  %2481 = vperm.xlu0 %3752, %v429_v0   ;;  %v3929_v63 = vld [vmem:[%s5128_s7 + $0x88] ss:$16 sps:$4 sm:$0xff]   ;;  %v3930_v0 = vld [vmem:[%s5128_s7 + $0xa0] ss:$16 sps:$4 sm:$0xff]  }
 0x787   : > { %2516 = vperm.xlu1 %3753, %v436_v1   ;;  %2491 = vperm.xlu0 %3752, %v431_v2   ;;  %v3931_v1 = vld [vmem:[%s5128_s7 + $0xac] ss:$16 sps:$4 sm:$0xff]   ;;  %v3933_v2 = vld [vmem:[%s5128_s7 + $0xc4] ss:$16 sps:$4 sm:$0xff]  }
 0x78b   : > { %2526 = vperm.xlu1 %3753, %v438_v3   ;;  %2501 = vperm.xlu0 %3752, %v433_v4   ;;  %v2477_v3 = vld [vmem:[%s5128_s7 + $0xe0] sm:$0xff]  ;;  %v3935_v4 = vld [vmem:[%s5128_s7 + $0xa8] ss:$16 sps:$4 sm:$0xff]  }
 0x78f   : > { %2536 = vperm.xlu1 %3753, %v440_v5   ;;  %2511 = vperm.xlu0 %3752, %v435_v6   ;;  %v3936_v5 = vld [vmem:[%s5128_s7 + $0xc0] ss:$16 sps:$4 sm:$0xff]   ;;  %v3937_v6 = vld [vmem:[%s5128_s7 + $0xcc] ss:$16 sps:$4 sm:$0xff]  }
 0x793   : > { %2546 = vperm.xlu1 %3753, %v442_v7   ;;  %2521 = vperm.xlu0 %3752, %v437_v8   ;;  %v3462_v7 = vcombine.high %v2477_v3, %v2477_v3  ;;  %v2478_v8 = vld [vmem:[%s5128_s7 + $0xe8] sm:$0xff] }
 0x797   : > { %2953 = vperm.xlu1 %3753, %v444_v9   ;;  %2531 = vperm.xlu0 %3752, %v439_v10   ;;  %v3940_v9 = vld [vmem:[%s5128_s7 + $0xc8] ss:$16 sps:$4 sm:$0xff]   ;;  %v3461_v10 = vcombine.low %v2477_v3, %v2477_v3 }
 0x79b   : > { %2963 = vperm.xlu1 %3753, %v446_v11   ;;  %2541 = vperm.xlu0 %3752, %v441_v12   ;;  %v3464_v11 = vcombine.high %v2478_v8, %v2478_v8  ;;  %v3463_v12 = vcombine.low %v2478_v8, %v2478_v8 }
 0x79f   : > { %2973 = vperm.xlu1 %3753, %v448_v13   ;;  %2551 = vperm.xlu0 %3752, %v443_v14   ;;  %v3944_v13 = vld [vmem:[%s5129_s8] sm:$0xff]  }
 0x7a3   : > { %2983 = vperm.xlu1 %3753, %v450_v16   ;;  %2958 = vperm.xlu0 %3752, %v445_v17  }
 0x7a7   : > { %2993 = vperm.xlu1 %3753, %v452_v18   ;;  %2968 = vperm.xlu0 %3752, %v447_v19  }
 0x7ab   : > { %3003 = vperm.xlu1 %3753, %v454_v20   ;;  %2978 = vperm.xlu0 %3752, %v449_v21  }
 0x7af   : > { %2988 = vperm.xlu0 %3752, %v451_v22  }
 0x7b3   : > { %2998 = vperm.xlu0 %3752, %v453_v23  }
 0x7b5   : > { %v2405_v27 = vpop.permute.xlu0 %2404 }
 0x7b7   : > { %3157 = vperm.xlu0 %3752, %v455_v24  }
 0x7bd   : > { %v2422_v25 = vpop.permute.xlu1 %2421 }
 0x7be   : > { %2822 = vmatpush1.bf16.msra.mxu1 %v2422_v25 }
 0x7bf   : > { %2823 = vmatprep.subr.bf16.mxu1 %v4139_v15 }
 0x7c5   : > { %v2424_v26 = vpop.permute.xlu1 %2423 }
 0x7c6   : > { %2824 = vmatpush1.bf16.msra.mxu1 %v2424_v26 }
 0x7c7   : > { %2825 = vmatprep.subr.bf16.mxu1 %v4139_v15 }
 0x7cd   : > { %v2396_v28 = vpop.permute.xlu0 %2395  ;;  %v2426_v29 = vpop.permute.xlu1 %2425 }
 0x7ce   : > { %3577 = vmatprep.subr.bf16.mxu0 %v2396_v28  ;;  %2826 = vmatpush1.bf16.msra.mxu1 %v2426_v29 }
 0x7cf   : > { %3578 = vmatpush3.bf16.msra.mxu0 %v4834_v36  ;;  %2827 = vmatprep.subr.bf16.mxu1 %v4139_v15 }
 0x7d1   : > { %v2435_v30 = vpop.permute.xlu1 %2434 }
 0x7d5   : > { %v2398_v31 = vpop.permute.xlu0 %2397  ;;  %v2428_v32 = vpop.permute.xlu1 %2427 }
 0x7d6   : > { %3579 = vmatprep.subr.bf16.mxu0 %v2398_v31  ;;  %2828 = vmatpush1.bf16.msra.mxu1 %v2428_v32 }
 0x7d7   : > { %3580 = vmatpush3.bf16.msra.mxu0 %v4838_v41  ;;  %2829 = vmatprep.subr.bf16.mxu1 %v4139_v15 }
 0x7d8   : > { %3581 = vmatprep.subr.bf16.mxu0 %v2405_v27 }
 0x7d9   : > { %v2407_v33 = vpop.permute.xlu0 %2406  ;;  %v2390_v34 = vpop.permute.xlu1 %2389 }
 0x7da   : > { %2830 = vmatpush1.bf16.msra.mxu1 %v2435_v30 }
 0x7db   : > { %3582 = vmatpush3.bf16.msra.mxu0 %v4842_v46  ;;  %2831 = vmatprep.subr.bf16.mxu1 %v4139_v15 }
 0x7dc   : > { %3583 = vmatprep.subr.bf16.mxu0 %v2407_v33 }
 0x7dd   : > { %v2409_v35 = vpop.permute.xlu0 %2408  ;;  %v2413_v37 = vpop.permute.xlu1 %2412 }
 0x7df   : > { %3584 = vmatpush3.bf16.msra.mxu0 %v4846_v51  ;;  %v3912_v51 = vld [vmem:[%s5128_s7 + $0x40] ss:$16 sps:$4 sm:$0xff]  }
 0x7e0   : > { %3585 = vmatprep.subr.bf16.mxu0 %v2409_v35 }
 0x7e1   : > { %v2411_v36 = vpop.permute.xlu0 %2410  ;;  %v2439_v39 = vpop.permute.xlu1 %2438 }
 0x7e3   : > { %3586 = vmatpush3.bf16.msra.mxu0 %v4854_v56  ;;  %v3919_v56 = vld [vmem:[%s5128_s7 + $0x6c] ss:$16 sps:$4 sm:$0xff]  }
 0x7e4   : > { %3587 = vmatprep.subr.bf16.mxu0 %v2411_v36 }
 0x7e5   : > { %v2437_v38 = vpop.permute.xlu0 %2436  ;;  %v2394_v42 = vpop.permute.xlu1 %2393 }
 0x7e6   : > { %2832 = vmatpush1.bf16.msra.mxu1 %v2437_v38 }
 0x7e7   : > { %3588 = vmatpush3.bf16.msra.mxu0 %v2390_v34  ;;  %2833 = vmatprep.subr.bf16.mxu1 %v4139_v15 }
 0x7e8   : > { %3589 = vmatprep.subr.bf16.mxu0 %v2413_v37 }
 0x7e9   : > { %v2392_v40 = vpop.permute.xlu0 %2391  ;;  %v2443_v46 = vpop.permute.xlu1 %2442 }
 0x7ea   : > { %2834 = vmatpush1.bf16.msra.mxu1 %v2439_v39 }
 0x7eb   : > { %3590 = vmatpush3.bf16.msra.mxu0 %v2392_v40  ;;  %2835 = vmatprep.subr.bf16.mxu1 %v4139_v15 }
 0x7ed   : > { %v2420_v41 = vpop.permute.xlu0 %2419 }
 0x7ee   : > { %3591 = vmatprep.subr.bf16.mxu0 %v2420_v41 }
 0x7ef   : > { %3592 = vmatpush3.bf16.msra.mxu0 %v2394_v42 }
 0x7f1   : > { %v2441_v45 = vpop.permute.xlu0 %2440 }
 0x7f2   : > { %2758 = vmatmul.mubr.bf16.vlgmr.msra.gmra.mrb[104].mxu0 %v3898_v43  ;;  %2836 = vmatpush1.bf16.msra.mxu1 %v2441_v45 }
 0x7f3   : > { %2837 = vmatprep.subr.bf16.mxu1 %v4139_v15  ;;  %2765 = vmatprep.mubr.bf16.mxu0 %v3904_v44  ;;  %v3911_v15 = vld [vmem:[%s5128_s7 + $0x28] ss:$16 sps:$4 sm:$0xff]  }
 0x7f6   : > { %2838 = vmatpush1.bf16.msra.mxu1 %v2443_v46 }
 0x7f9   : > { %2854 = vmatmul.mubr.bf16.vlgmr.msra.gmra.mrb[108].mxu1 %v3901_v47 }
 0x7fa   : > { %2766 = vmatmul.mubr.bf16.gmra.mrb[108].mxu0 %v3906_v48  ;;  %3466 = vmatprep.mubr.msk.bf16.mxu1 %vm2700_vm9, %v3907_v49  ;;  %v2487_v23 = vpop.permute.xlu1 %2486 }
 0x7fb   : > { %2773 = vmatprep.mubr.bf16.mxu0 %v3909_v50 }
 0x7fe   : > { %v2497_v39 = vpop.permute.xlu1 %2496 }
 0x801   : > { %2862 = vmatmul.mubr.bf16.gmra.mrb[112].mxu1 %v3911_v15 }
 0x802   : > { %2774 = vmatmul.mubr.bf16.gmra.mrb[112].mxu0 %v3912_v51  ;;  %3467 = vmatprep.mubr.msk.bf16.mxu1 %vm2700_vm9, %v3913_v52  ;;  %v2482_v21 = vpop.permute.xlu0 %2481 }
 0x803   : > { %2781 = vmatprep.mubr.bf16.mxu0 %v3915_v53 }
 0x806   : > { %v2492_v37 = vpop.permute.xlu0 %2491 }
 0x809   : > { %2870 = vmatmul.mubr.bf16.gmra.mrb[116].mxu1 %v3917_v54 }
 0x80a   : > { %2782 = vmatmul.mubr.bf16.gmra.mrb[116].mxu0 %v3918_v55  ;;  %3468 = vmatprep.mubr.msk.bf16.mxu1 %vm2700_vm9, %v3919_v56  ;;  %v2502_v53 = vpop.permute.xlu0 %2501  ;;  %v2507_v56 = vpop.permute.xlu1 %2506 }
 0x80b   : > { %2789 = vmatprep.mubr.bf16.mxu0 %v3921_v57 }
 0x811   : > { %2878 = vmatmul.mubr.bf16.gmra.mrb[120].mxu1 %v3923_v58 }
 0x812   : > { %2790 = vmatmul.mubr.bf16.gmra.mrb[120].mxu0 %v3924_v59  ;;  %3469 = vmatprep.mubr.msk.bf16.mxu1 %vm2700_vm9, %v3925_v61 }
 0x813   : > { %2797 = vmatprep.mubr.bf16.mxu0 %v3927_v62 }
 0x819   : > { %2886 = vmatmul.mubr.bf16.gmra.mrb[124].mxu1 %v3929_v63 }
 0x81a   : > { %2798 = vmatmul.mubr.bf16.gmra.mrb[124].mxu0 %v3930_v0  ;;  %3470 = vmatprep.mubr.msk.bf16.mxu1 %vm2700_vm9, %v3931_v1 }
 0x81b   : > { %2805 = vmatprep.mubr.bf16.mxu0 %v3933_v2 }
 0x821   : > { %2894 = vmatmul.mubr.bf16.gmra.mrb[128].mxu1 %v3935_v4 }
 0x822   : > { %2806 = vmatmul.mubr.bf16.gmra.mrb[128].mxu0 %v3936_v5  ;;  %3471 = vmatprep.mubr.msk.bf16.mxu1 %vm2700_vm9, %v3937_v6 }
 0x823   : > { %2813 = vmatprep.mubr.bf16.mxu0 %v3462_v7 }
 0x829   : > { %2902 = vmatmul.mubr.bf16.gmra.mrb[132].mxu1 %v3940_v9  ;;  %v2512_v9 = vpop.permute.xlu0 %2511 }
 0x82a   : > { %2814 = vmatmul.mubr.bf16.gmra.mrb[132].mxu0 %v3461_v10  ;;  %3472 = vmatprep.mubr.msk.bf16.mxu1 %vm2700_vm9, %v3464_v11 }
 0x82b   : > { %3708 = vmatprep.mubr.msk.bf16.mxu0 %vm480_vm1, %v3944_v13 }
 0x831   : > { %2910 = vmatmul.mubr.bf16.gmra.mrb[136].mxu1 %v3463_v12  ;;  %v2517_v12 = vpop.permute.xlu1 %2516 }
 0x8c5   : > { %v3593_v14 = vpop.f32.mrb[104].mxu0 }
 0x8c6   : > { %v3594_v16 = vpop.f32.mrb[105].mxu0 }
 0x8c7   : > { %v3595_v17 = vadd.f32 %v3594_v16, %v3593_v14  ;;  %v3596_v18 = vpop.f32.mrb[106].mxu0 }
 0x8c8   : > { %v3597_v19 = vpop.f32.mrb[107].mxu0 }
 0x8c9   : > { %v3598_v20 = vadd.f32 %v3597_v19, %v3596_v18  ;;  %v2760_v22 = vadd.f32 %v3595_v17, %v2482_v21 }
 0x8cb   : > { %v2763_v28 = vadd.f32 %v3598_v20, %v2487_v23 }
 0x8cc   : > { %v2855_v24 = vpop.f32.mrb[108].mxu1 }
 0x8cd   : > { %v2856_v25 = vadd.f32 %v2855_v24, %v2760_v22  ;;  %v3599_v26 = vpop.f32.mrb[108].mxu0  ;;  %v2857_v27 = vpop.f32.mrb[109].mxu1 }
 0x8ce   : > { %v3600_v29 = vpop.f32.mrb[109].mxu0  ;;  %v2858_v30 = vpop.f32.mrb[110].mxu1 }
 0x8cf   : > { %v3601_v31 = vadd.f32 %v3600_v29, %v3599_v26  ;;  %v2859_v32 = vadd.f32 %v2858_v30, %v2763_v28  ;;  %v3602_v33 = vpop.f32.mrb[110].mxu0  ;;  %v2860_v34 = vpop.f32.mrb[111].mxu1  ;;  %4075 = vtanh.f32 %v2856_v25 }
 0x8d0   : > { %v3603_v35 = vpop.f32.mrb[111].mxu0  ;;  %v2522_v29 = vpop.permute.xlu0 %2521 }
 0x8d1   : > { %4077 = vtanh.f32 %v2859_v32  ;;  %v3604_v36 = vadd.f32 %v3603_v35, %v3602_v33  ;;  %v2768_v38 = vadd.f32 %v3601_v31, %v2492_v37  ;;  %v2527_v32 = vpop.permute.xlu1 %2526 }
 0x8d3   : > { %v2771_v44 = vadd.f32 %v3604_v36, %v2497_v39 }
 0x8d4   : > { %v2863_v40 = vpop.f32.mrb[112].mxu1 }
 0x8d5   : > { %v2864_v41 = vadd.f32 %v2863_v40, %v2768_v38  ;;  %v3605_v42 = vpop.f32.mrb[112].mxu0  ;;  %v2865_v43 = vpop.f32.mrb[113].mxu1 }
 0x8d6   : > { %v3606_v45 = vpop.f32.mrb[113].mxu0  ;;  %v2866_v46 = vpop.f32.mrb[114].mxu1 }
 0x8d7   : > { %v3607_v47 = vadd.f32 %v3606_v45, %v3605_v42  ;;  %v2867_v48 = vadd.f32 %v2866_v46, %v2771_v44  ;;  %v3608_v49 = vpop.f32.mrb[114].mxu0  ;;  %v2868_v50 = vpop.f32.mrb[115].mxu1  ;;  %4079 = vtanh.f32 %v2864_v41 }
 0x8d8   : > { %v3609_v15 = vpop.f32.mrb[115].mxu0 }
 0x8d9   : > { %4081 = vtanh.f32 %v2867_v48  ;;  %v3610_v51 = vadd.f32 %v3609_v15, %v3608_v49  ;;  %v4076_v52 = vpop.eup %4075  ;;  %v2776_v55 = vadd.f32 %v3607_v47, %v2502_v53  ;;  %v2532_v48 = vpop.permute.xlu0 %2531 }
 0x8da   : > { %v2537_v15 = vpop.permute.xlu1 %2536 }
 0x8db   : > { %v4078_v54 = vpop.eup %4077  ;;  %v2779_v63 = vadd.f32 %v3610_v51, %v2507_v56 }
 0x8dc   : > { %v2871_v57 = vpop.f32.mrb[116].mxu1  ;;  %v2943_v58 = vpack.c.bf16 %v4078_v54, %v4076_v52 }
 0x8dd   : > { %v2872_v59 = vadd.f32 %v2871_v57, %v2776_v55  ;;  %v3611_v61 = vpop.f32.mrb[116].mxu0  ;;  %v2873_v62 = vpop.f32.mrb[117].mxu1 }
 0x8de   : > { %v3612_v0 = vpop.f32.mrb[117].mxu0  ;;  %v2874_v1 = vpop.f32.mrb[118].mxu1  ;;  %3692 = vmatprep.subr.bf16.mxu0 %v2943_v58 }
 0x8df   : > { %v3613_v2 = vadd.f32 %v3612_v0, %v3611_v61  ;;  %v2875_v3 = vadd.f32 %v2874_v1, %v2779_v63  ;;  %v3614_v4 = vpop.f32.mrb[118].mxu0  ;;  %3693 = vmatpush3.bf16.msra.mxu0 %v2943_v58  ;;  %v2876_v5 = vpop.f32.mrb[119].mxu1  ;;  %4083 = vtanh.f32 %v2872_v59 }
 0x8e0   : > { %v3615_v6 = vpop.f32.mrb[119].mxu0 }
 0x8e1   : > { %4085 = vtanh.f32 %v2875_v3  ;;  %v3616_v7 = vadd.f32 %v3615_v6, %v3614_v4  ;;  %v4080_v8 = vpop.eup %4079  ;;  %v2784_v11 = vadd.f32 %v3613_v2, %v2512_v9  ;;  %v2542_v3 = vpop.permute.xlu0 %2541 }
 0x8e2   : > { %v2547_v6 = vpop.permute.xlu1 %2546 }
 0x8e3   : > { %v4082_v10 = vpop.eup %4081  ;;  %v2787_v19 = vadd.f32 %v3616_v7, %v2517_v12 }
 0x8e4   : > { %v2879_v13 = vpop.f32.mrb[120].mxu1  ;;  %v2944_v14 = vpack.c.bf16 %v4082_v10, %v4080_v8 }
 0x8e5   : > { %v2880_v16 = vadd.f32 %v2879_v13, %v2784_v11  ;;  %v3617_v17 = vpop.f32.mrb[120].mxu0  ;;  %v2881_v18 = vpop.f32.mrb[121].mxu1 }
 0x8e6   : > { %v3618_v20 = vpop.f32.mrb[121].mxu0  ;;  %v2882_v21 = vpop.f32.mrb[122].mxu1  ;;  %3694 = vmatprep.subr.bf16.mxu0 %v2944_v14 }
 0x8e7   : > { %v3619_v22 = vadd.f32 %v3618_v20, %v3617_v17  ;;  %v2883_v23 = vadd.f32 %v2882_v21, %v2787_v19  ;;  %v3620_v24 = vpop.f32.mrb[122].mxu0  ;;  %3695 = vmatpush3.bf16.msra.mxu0 %v2944_v14  ;;  %v2884_v25 = vpop.f32.mrb[123].mxu1  ;;  %4087 = vtanh.f32 %v2880_v16 }
 0x8e8   : > { %v3621_v26 = vpop.f32.mrb[123].mxu0 }
 0x8e9   : > { %4089 = vtanh.f32 %v2883_v23  ;;  %v3622_v27 = vadd.f32 %v3621_v26, %v3620_v24  ;;  %v4084_v28 = vpop.eup %4083  ;;  %v2792_v31 = vadd.f32 %v3619_v22, %v2522_v29  ;;  %v2552_v22 = vpop.permute.xlu0 %2551 }
 0x8eb   : > { %v4086_v30 = vpop.eup %4085  ;;  %v2795_v38 = vadd.f32 %v3622_v27, %v2527_v32 }
 0x8ec   : > { %v2887_v33 = vpop.f32.mrb[124].mxu1  ;;  %v2945_v34 = vpack.c.bf16 %v4086_v30, %v4084_v28 }
 0x8ed   : > { %v2888_v35 = vadd.f32 %v2887_v33, %v2792_v31  ;;  %v3623_v36 = vpop.f32.mrb[124].mxu0  ;;  %v2889_v37 = vpop.f32.mrb[125].mxu1 }
 0x8ee   : > { %v3624_v39 = vpop.f32.mrb[125].mxu0  ;;  %v2890_v40 = vpop.f32.mrb[126].mxu1  ;;  %3696 = vmatprep.subr.bf16.mxu0 %v2945_v34  ;;  %v3945_v37 = vld [vmem:[%s5129_s8 + $0x8] sm:$0xff]  }
 0x8ef   : > { %v3625_v41 = vadd.f32 %v3624_v39, %v3623_v36  ;;  %v2891_v42 = vadd.f32 %v2890_v40, %v2795_v38  ;;  %v3626_v43 = vpop.f32.mrb[126].mxu0  ;;  %3697 = vmatpush3.bf16.msra.mxu0 %v2945_v34  ;;  %v2892_v44 = vpop.f32.mrb[127].mxu1  ;;  %4091 = vtanh.f32 %v2888_v35  ;;  %v3946_v38 = vld [vmem:[%s5129_s8 + $0x10] sm:$0xff]   ;;  %v3947_v39 = vld [vmem:[%s5129_s8 + $0x18] sm:$0xff]   ;;  %v3948_v40 = vld [vmem:[%s5129_s8 + $0x20] sm:$0xff]  }
 0x8f0   : > { %v3627_v45 = vpop.f32.mrb[127].mxu0  ;;  %v2959_v44 = vpop.permute.xlu0 %2958 }
 0x8f1   : > { %4093 = vtanh.f32 %v2891_v42  ;;  %v3628_v46 = vadd.f32 %v3627_v45, %v3626_v43  ;;  %v4088_v47 = vpop.eup %4087  ;;  %v2800_v50 = vadd.f32 %v3625_v41, %v2532_v48  ;;  %v3949_v41 = vld [vmem:[%s5129_s8 + $0x28] ss:$0 sps:$4 sm:$0x33]   ;;  %v2954_v42 = vpop.permute.xlu1 %2953 }
 0x8f3   : > { %v4090_v49 = vpop.eup %4089  ;;  %v2803_v56 = vadd.f32 %v3628_v46, %v2537_v15 }
 0x8f4   : > { %v2895_v51 = vpop.f32.mrb[128].mxu1  ;;  %v2946_v52 = vpack.c.bf16 %v4090_v49, %v4088_v47  ;;  %v2969_v46 = vpop.permute.xlu0 %2968 }
 0x8f5   : > { %v2896_v53 = vadd.f32 %v2895_v51, %v2800_v50  ;;  %v3629_v54 = vpop.f32.mrb[128].mxu0  ;;  %v2897_v55 = vpop.f32.mrb[129].mxu1 }
 0x8f6   : > { %v3630_v57 = vpop.f32.mrb[129].mxu0  ;;  %v2898_v58 = vpop.f32.mrb[130].mxu1  ;;  %3698 = vmatprep.subr.bf16.mxu0 %v2946_v52 }
 0x8f7   : > { %v3631_v59 = vadd.f32 %v3630_v57, %v3629_v54  ;;  %v2899_v61 = vadd.f32 %v2898_v58, %v2803_v56  ;;  %v3632_v62 = vpop.f32.mrb[130].mxu0  ;;  %3699 = vmatpush3.bf16.msra.mxu0 %v2946_v52  ;;  %v2900_v63 = vpop.f32.mrb[131].mxu1  ;;  %4095 = vtanh.f32 %v2896_v53 }
 0x8f8   : > { %v3633_v0 = vpop.f32.mrb[131].mxu0  ;;  %v2964_v43 = vpop.permute.xlu1 %2963 }
 0x8f9   : > { %4097 = vtanh.f32 %v2899_v61  ;;  %v3634_v1 = vadd.f32 %v3633_v0, %v3632_v62  ;;  %v4092_v2 = vpop.eup %4091  ;;  %v2808_v5 = vadd.f32 %v3631_v59, %v2542_v3  ;;  %v2979_v54 = vpop.permute.xlu0 %2978 }
 0x8fb   : > { %v4094_v4 = vpop.eup %4093  ;;  %v2811_v12 = vadd.f32 %v3634_v1, %v2547_v6 }
 0x8fc   : > { %v2903_v7 = vpop.f32.mrb[132].mxu1  ;;  %v2947_v8 = vpack.c.bf16 %v4094_v4, %v4092_v2  ;;  %v2974_v45 = vpop.permute.xlu1 %2973 }
 0x8fd   : > { %v2904_v9 = vadd.f32 %v2903_v7, %v2808_v5  ;;  %v3635_v10 = vpop.f32.mrb[132].mxu0  ;;  %v2905_v11 = vpop.f32.mrb[133].mxu1 }
 0x8fe   : > { %v3636_v13 = vpop.f32.mrb[133].mxu0  ;;  %v2906_v14 = vpop.f32.mrb[134].mxu1  ;;  %3700 = vmatprep.subr.bf16.mxu0 %v2947_v8 }
 0x8ff   : > { %v3637_v16 = vadd.f32 %v3636_v13, %v3635_v10  ;;  %v2907_v17 = vadd.f32 %v2906_v14, %v2811_v12  ;;  %3701 = vmatpush3.bf16.msra.mxu0 %v2947_v8  ;;  %v2908_v18 = vpop.f32.mrb[135].mxu1  ;;  %v3638_v19 = vpop.f32.mrb[134].mxu0  ;;  %4099 = vtanh.f32 %v2904_v9 }
 0x900   : > { %v3639_v20 = vpop.f32.mrb[135].mxu0  ;;  %v2984_v51 = vpop.permute.xlu1 %2983 }
 0x901   : > { %4101 = vtanh.f32 %v2907_v17  ;;  %v4096_v21 = vpop.eup %4095  ;;  %v2816_v24 = vadd.f32 %v3637_v16, %v2552_v22  ;;  %v2989_v61 = vpop.permute.xlu0 %2988 }
 0x903   : > { %v4098_v23 = vpop.eup %4097 }
 0x904   : > { %v2911_v25 = vpop.f32.mrb[136].mxu1  ;;  %v2948_v26 = vpack.c.bf16 %v4098_v23, %v4096_v21  ;;  %v2994_v57 = vpop.permute.xlu1 %2993 }
 0x905   : > { %v2912_v27 = vadd.f32 %v2911_v25, %v2816_v24  ;;  %v2913_v28 = vpop.f32.mrb[137].mxu1  ;;  %v2999_v16 = vpop.permute.xlu0 %2998 }
 0x906   : > { %3702 = vmatprep.subr.bf16.mxu0 %v2948_v26  ;;  %v2914_v29 = vpop.f32.mrb[138].mxu1 }
 0x907   : > { %4103 = vtanh.f32 %v2912_v27  ;;  %3703 = vmatpush3.bf16.msra.mxu0 %v2948_v26  ;;  %v2915_v30 = vpop.f32.mrb[139].mxu1 }
 0x908   : > { %v3004_v7 = vpop.permute.xlu1 %3003 }
 0x909   : > { %v4100_v31 = vpop.eup %4099 }
 0x90b   : > { %v4102_v32 = vpop.eup %4101 }
 0x90c   : > { %v2949_v33 = vpack.c.bf16 %v4102_v32, %v4100_v31  ;;  %v3950_v31 = vld [vmem:[%s5130_s9] sm:$0x1f]   ;;  %v3158_v32 = vpop.permute.xlu0 %3157 }
 0x90e   : > { %3704 = vmatprep.subr.bf16.mxu0 %v2949_v33 }
 0x90f   : > { %3705 = vmatpush3.bf16.msra.mxu0 %v2949_v33  ;;  %v3165_v33 = vrot.slane %v3158_v32, 4 }
 0x911   : > { %v4104_v34 = vpop.eup %4103 }
 0x912   : > { %v2950_v35 = vpack.c.bf16 %v4104_v34, %v4104_v34  ;;  %v3164_v34 = vrot.slane %v3004_v7, 4 }
 0x914   : > { %3736 = vmatprep.subr.msk.bf16.mxu0 %vm1078_vm6, %v2950_v35  ;;  %v3054_v36 = vsel %vm1078_vm6, %v2950_v35, 0  ;;  %v3166_v35 = vsel %vm1078_vm6, %v3164_v34, %v3165_v33 }
 0x915   : > { %3707 = vmatpush3.bf16.msra.mxu0 %v3054_v36 }
 0x916   : > { %3720 = vmatprep.subr.bf16.mxu0 %v4140_v60 }
 0x918   : > { %3709 = vmatmul.mubr.msk.bf16.vlgmr.msra.gmra.mrb[136].mxu0 %vm480_vm1, %v3945_v37 }
 0x919   : > { %3712 = vmatprep.mubr.msk.bf16.mxu0 %vm480_vm1, %v3946_v38 }
 0x920   : > { %3713 = vmatmul.mubr.msk.bf16.gmra.mrb[140].mxu0 %vm480_vm1, %v3947_v39 }
 0x921   : > { %3716 = vmatprep.mubr.msk.bf16.mxu0 %vm480_vm1, %v3948_v40 }
 0x928   : > { %3717 = vmatmul.mubr.msk.bf16.gmra.mrb[144].mxu0 %vm480_vm1, %v3949_v41 }
 0x929   : > { %3732 = vmatprep.mubr.msk.bf16.mxu0 %vm4141_vm7, %v4140_v60 }
 0x9eb   : > { %v3710_v47 = vpop.f32.mrb[136].mxu0 }
 0x9ec   : > { %v3099_v48 = vadd.f32 %v3710_v47, %v2964_v43  ;;  %v3090_v49 = vpop.f32.mrb[137].mxu0 }
 0x9ed   : > { %v3091_v50 = vadd.f32 %v3090_v49, %v2954_v42  ;;  %v3711_v15 = vpop.f32.mrb[138].mxu0 }
 0x9ee   : > { %4105 = vtanh.f32 %v3099_v48  ;;  %v3102_v52 = vadd.f32 %v3711_v15, %v2969_v46  ;;  %v3093_v53 = vpop.f32.mrb[139].mxu0 }
 0x9ef   : > { %4107 = vtanh.f32 %v3091_v50  ;;  %v3094_v55 = vadd.f32 %v3093_v53, %v2959_v44 }
 0x9f0   : > { %4109 = vtanh.f32 %v3102_v52 }
 0x9f1   : > { %4111 = vtanh.f32 %v3094_v55 }
 0x9f3   : > { %v3714_v56 = vpop.f32.mrb[140].mxu0 }
 0x9f4   : > { %v3115_v58 = vadd.f32 %v3714_v56, %v2984_v51  ;;  %v3106_v59 = vpop.f32.mrb[141].mxu0 }
 0x9f5   : > { %v3107_v62 = vadd.f32 %v3106_v59, %v2974_v45  ;;  %v3715_v63 = vpop.f32.mrb[142].mxu0 }
 0x9f6   : > { %4113 = vtanh.f32 %v3115_v58  ;;  %v3118_v0 = vadd.f32 %v3715_v63, %v2989_v61  ;;  %v3109_v1 = vpop.f32.mrb[143].mxu0 }
 0x9f7   : > { %4115 = vtanh.f32 %v3107_v62  ;;  %v3110_v2 = vadd.f32 %v3109_v1, %v2979_v54 }
 0x9f8   : > { %v4106_v3 = vpop.eup %4105  ;;  %4117 = vtanh.f32 %v3118_v0 }
 0x9f9   : > { %v4108_v4 = vpop.eup %4107  ;;  %4119 = vtanh.f32 %v3110_v2 }
 0x9fa   : > { %v4110_v5 = vpop.eup %4109 }
 0x9fb   : > { %v4112_v6 = vpop.eup %4111  ;;  %v3718_v8 = vpop.f32.mrb[144].mxu0  ;;  %v3150_v9 = vpack.c.bf16 %v4110_v5, %v4106_v3 }
 0x9fc   : > { %v3131_v10 = vadd.f32 %v3718_v8, %v3004_v7  ;;  %v3122_v11 = vpop.f32.mrb[145].mxu0  ;;  %v3149_v12 = vpack.c.bf16 %v4112_v6, %v4108_v4 }
 0x9fd   : > { %v3123_v13 = vadd.f32 %v3122_v11, %v2994_v57  ;;  %v3719_v14 = vpop.f32.mrb[146].mxu0 }
 0x9fe   : > { %v3125_v17 = vpop.f32.mrb[147].mxu0  ;;  %3721 = vmatpush3.bf16.msra.mxu0 %v3149_v12  ;;  %4121 = vtanh.f32 %v3131_v10 }
 0x9ff   : > { %v3126_v18 = vadd.f32 %v3125_v17, %v2999_v16  ;;  %3722 = vmatprep.subr.bf16.mxu0 %v4140_v60  ;;  %4123 = vtanh.f32 %v3123_v13 }
 0xa00   : > { %v4114_v19 = vpop.eup %4113 }
 0xa01   : > { %v4116_v20 = vpop.eup %4115  ;;  %4125 = vtanh.f32 %v3126_v18 }
 0xa02   : > { %v4118_v21 = vpop.eup %4117  ;;  %3723 = vmatpush3.bf16.msra.mxu0 %v3150_v9 }
 0xa03   : > { %v4120_v22 = vpop.eup %4119  ;;  %3724 = vmatprep.subr.bf16.mxu0 %v4140_v60  ;;  %v3152_v23 = vpack.c.bf16 %v4118_v21, %v4114_v19 }
 0xa04   : > { %v3151_v24 = vpack.c.bf16 %v4120_v22, %v4116_v20 }
 0xa06   : > { %3725 = vmatpush3.bf16.msra.mxu0 %v3151_v24 }
 0xa07   : > { %3726 = vmatprep.subr.bf16.mxu0 %v4140_v60 }
 0xa08   : > { %v4122_v25 = vpop.eup %4121 }
 0xa09   : > { %v4124_v26 = vpop.eup %4123  ;;  %v3154_v29 = vpack.c.bf16 %v4122_v25, %v4122_v25 }
 0xa0a   : > { %3727 = vmatpush3.bf16.msra.mxu0 %v3152_v23 }
 0xa0b   : > { %v4126_v27 = vpop.eup %4125  ;;  %3728 = vmatprep.subr.bf16.mxu0 %v4140_v60  ;;  %v3175_v30 = vsel %vm3173_vm10, %v3154_v29, 0 }
 0xa0c   : > { %v3153_v28 = vpack.c.bf16 %v4126_v27, %v4124_v26 }
 0xa0e   : > { %3729 = vmatpush3.bf16.msra.mxu0 %v3153_v28 }
 0xa0f   : > { %3730 = vmatprep.subr.bf16.mxu0 %v4140_v60 }
 0xa12   : > { %3731 = vmatpush3.bf16.msra.mxu0 %v3175_v30 }
 0xa15   : > { %3733 = vmatmul.mubr.msk.bf16.vlgmr.msra.gmra.mrb[148].mxu0 %vm3169_vm11, %v3950_v31 }
 0xae8   : > { %v3211_v36 = vpop.f32.mrb[148].mxu0 }
 0xae9   : > { %v3212_v60 = vadd.f32 %v3211_v36, %v3166_v35  ;;  %v3734_v37 = vpop.f32.mrb[149].mxu0 }
 0xaea   : > { %v3214_v38 = vpop.f32.mrb[150].mxu0 }
 0xaeb   : > { %3219 = vst.msk [vmem:[%s386_s20] sm:$0xff] %vm3218_vm12, %v3212_v60  ;;  %v3215_v39 = vadd.f32 %v3214_v38, %v3165_v33  ;;  %v3735_v40 = vpop.f32.mrb[151].mxu0 }
 0xaed   : > { %3221 = vst.msk [vmem:[%s386_s20 + $0x8] sm:$0x3] %vm3220_vm13, %v3215_v39 }
 0xaee PF: > { %s21_s17 = sadd.s32 1, %s4133_s17  }
 0xaef   : > { %p18_p4 = scmp.ge.s32.totalorder %s21_s17, 4  }
 0xaf1   :  { %20 = sbr.rel (!%p18_p4) target bundleno = 1 (0x1), region = 94 }

</bundles_post_ra>
